<compile_context>
chip_gen: v6e
topology: v6e:2x2x1
jax: 0.10.0
libtpu: 0.0.40
codegen_flags: <defaults>
</compile_context>

<pallas_src>
import functools

import jax
import jax.numpy as jnp
from jax.experimental import pallas as pl
from jax.experimental.pallas import tpu as pltpu


def _attention_kernel(q_ref, k_ref, v_ref,
                      wq_ref, wk_ref, wv_ref,
                      wo_ref, bo_ref,
                      out_ref,
                      *, scale, heads, dim_head):
    f32 = jnp.float32
    bf16 = jnp.bfloat16

    q2 = q_ref[0]                     # (tq, dim)  bf16
    k2 = k_ref[0]                     # (Nk, dim)  bf16
    v2 = v_ref[0]                     # (Nk, dim)  bf16
    tq = q2.shape[0]
    nk = k2.shape[0]

    # Fused QKV projections at full lane width (dim -> H*d); bf16 MXU operands
    # with f32 accumulation.  Softmax scale folded into the projected queries.
    qp = jnp.dot(q2, wq_ref[...], preferred_element_type=f32) * scale
    kp = jnp.dot(k2, wk_ref[...], preferred_element_type=f32)
    vp = jnp.dot(v2, wv_ref[...], preferred_element_type=f32)

    # One relayout per tensor: (N, H*d) -> (H, N, d).  Cast to bf16 first so
    # the relayout moves half the bytes and the MXU sees bf16 operands.
    def to_heads(x, n):
        return jnp.transpose(x.astype(bf16).reshape(n, heads, dim_head),
                             (1, 0, 2))

    qh = to_heads(qp, tq)             # (H, tq, d)
    kh = to_heads(kp, nk)             # (H, Nk, d)
    vh = to_heads(vp, nk)             # (H, Nk, d)

    # Scores for all heads in one batched matmul; softmax statistics in f32.
    dots = jnp.einsum('hqd,hkd->hqk', qh, kh,
                      preferred_element_type=f32)          # (H, tq, Nk)
    m = jnp.max(dots, axis=-1, keepdims=True)
    e = jnp.exp(dots - m)
    s = jnp.sum(e, axis=-1, keepdims=True)
    inv = pl.reciprocal(s)            # exact divide (correctness concern)

    # P @ V batched over heads; softmax normalization folded into the
    # (H, tq, d) head outputs (cheaper than normalizing the (H, tq, Nk) probs).
    oh = jnp.einsum('hqk,hkd->hqd', e.astype(bf16), vh,
                    preferred_element_type=f32) * inv      # (H, tq, d)

    # Per-head output projection accumulated over heads into (tq, dim):
    # wo is passed as (H, d, dim), so there is no lane-dim concatenate.
    op = jnp.einsum('hqd,hdm->hqm', oh.astype(bf16), wo_ref[...],
                    preferred_element_type=f32)            # (H, tq, dim)
    out_ref[0] = (jnp.sum(op, axis=0) + bo_ref[...]).astype(out_ref.dtype)


def attention_pallas(q, k, v, wq, wk, wv, wo, bo, *, heads, dim_head, tq=None):
    """q: (B, Nq, dim), k/v: (B, Nk, dim).
    wq/wk/wv: (dim, heads*dim_head) (JAX convention y = x @ W).
    wo: (heads*dim_head, dim), bo: (dim,)."""
    B, Nq, dim = q.shape
    _, Nk, _ = k.shape
    inner = heads * dim_head
    scale = dim_head ** (-0.5)
    out_dtype = q.dtype

    if tq is None:
        tq = Nq if Nq <= 128 else 128
    assert Nq % tq == 0, "Nq must be divisible by the query tile size"

    bf16 = jnp.bfloat16
    qb, kb, vb = q.astype(bf16), k.astype(bf16), v.astype(bf16)
    wqb, wkb, wvb = wq.astype(bf16), wk.astype(bf16), wv.astype(bf16)
    wo3 = wo.reshape(heads, dim_head, dim).astype(bf16)     # (H, d, dim)
    bo2 = bo.reshape(1, dim).astype(jnp.float32)

    kernel = functools.partial(_attention_kernel, scale=scale,
                               heads=heads, dim_head=dim_head)

    def build(single_buffer_weights):
        def resident(shape):
            kwargs = {}
            if single_buffer_weights and hasattr(pl, "Buffered"):
                # Constant index_map -> one buffer is enough; halves the
                # resident-weight VMEM footprint (matters on v7x's 64 MiB).
                kwargs["pipeline_mode"] = pl.Buffered(1)
            return pl.BlockSpec(shape, lambda b, qi: (0,) * len(shape),
                                **kwargs)

        grid_spec = pltpu.PrefetchScalarGridSpec(
            num_scalar_prefetch=0,
            grid=(B, Nq // tq),
            in_specs=[
                pl.BlockSpec((1, tq, dim), lambda b, qi: (b, qi, 0)),   # q tile
                pl.BlockSpec((1, Nk, dim), lambda b, qi: (b, 0, 0)),    # k
                pl.BlockSpec((1, Nk, dim), lambda b, qi: (b, 0, 0)),    # v
                resident((dim, inner)),                                 # wq
                resident((dim, inner)),                                 # wk
                resident((dim, inner)),                                 # wv
                resident((heads, dim_head, dim)),                       # wo
                resident((1, dim)),                                     # bias
            ],
            out_specs=pl.BlockSpec((1, tq, dim), lambda b, qi: (b, qi, 0)),
        )
        return pl.pallas_call(
            kernel,
            out_shape=jax.ShapeDtypeStruct((B, Nq, dim), out_dtype),
            grid_spec=grid_spec,
            compiler_params=pltpu.CompilerParams(
                dimension_semantics=("parallel", "parallel"),
                # Explicit limit with headroom under v7x's 64 MiB physical VMEM
                # (also raises v5e's 16 MiB scoped default).
                vmem_limit_bytes=48 * 1024 * 1024),
        )

    args = (qb, kb, vb, wqb, wkb, wvb, wo3, bo2)
    try:
        return build(True)(*args)
    except Exception:
        # TODO(synk): drop this fallback once pipeline_mode=pl.Buffered(1)
        # (single-buffered resident weights) is guaranteed by the jax version.
        return build(False)(*args)


def attention_ref(q, k, v, wq, wk, wv, wo, bo, *, heads, dim_head):
    """Pure-JAX f32 reference reproducing the PyTorch forward (dropout=identity)."""
    B, Nq, dim = q.shape
    scale = dim_head ** (-0.5)
    qp = q @ wq
    kp = k @ wk
    vp = v @ wv

    def split_heads(t):
        b, n, _ = t.shape
        return t.reshape(b, n, heads, dim_head).transpose(0, 2, 1, 3)

    qh, kh, vh = map(split_heads, (qp, kp, vp))
    dots = jnp.einsum('bhqd,bhkd->bhqk', qh, kh) * scale
    attn = jax.nn.softmax(dots, axis=-1)
    outh = jnp.einsum('bhqk,bhkd->bhqd', attn, vh)
    out = outh.transpose(0, 2, 1, 3).reshape(B, Nq, heads * dim_head)
    return out @ wo + bo


if __name__ == "__main__":
    # Small, module-consistent shapes (dim chosen as a 128-multiple so the
    # stored output slab is lane-dense, per the performance review).
    B = 2
    dim = 128
    heads = 4
    dim_head = 32
    inner = heads * dim_head
    Nq = 16
    Nk = 16

    key = jax.random.PRNGKey(0)
    kq, kk, kv, k1, k2, k3, k4, k5 = jax.random.split(key, 8)

    q = jax.random.normal(kq, (B, Nq, dim), dtype=jnp.float32)
    k = jax.random.normal(kk, (B, Nk, dim), dtype=jnp.float32)
    v = jax.random.normal(kv, (B, Nk, dim), dtype=jnp.float32)

    # Deterministic parameter init (JAX convention: y = x @ W [+ b]).
    wq = jax.random.normal(k1, (dim, inner), dtype=jnp.float32) * 0.05
    wk = jax.random.normal(k2, (dim, inner), dtype=jnp.float32) * 0.05
    wv = jax.random.normal(k3, (dim, inner), dtype=jnp.float32) * 0.05
    wo = jax.random.normal(k4, (inner, dim), dtype=jnp.float32) * 0.05
    bo = jax.random.normal(k5, (dim,), dtype=jnp.float32) * 0.05

    out = attention_pallas(q, k, v, wq, wk, wv, wo, bo,
                           heads=heads, dim_head=dim_head)
    out = jax.block_until_ready(out)

    ref = attention_ref(q, k, v, wq, wk, wv, wo, bo,
                        heads=heads, dim_head=dim_head)

    assert out.shape == (B, Nq, dim)
    # Tolerance accounts for bf16 MXU operands (f32 accumulation, f32 softmax
    # statistics); expected deviation vs. the f32 reference is a few 1e-3.
    max_diff = jnp.max(jnp.abs(out - ref))
    assert jnp.allclose(out, ref, atol=5e-2, rtol=5e-2), \
        f"max abs diff {max_diff}"

    print("KERNEL_OK")
</pallas_src>

<mosaic_0001>
module attributes {stable_mosaic.version = 11 : i64} {
  func.func @_attention_kernel(%arg0: i32, %arg1: i32, %arg2: memref<1x16x128xbf16, #tpu.memory_space<vmem>>, %arg3: memref<1x16x128xbf16, #tpu.memory_space<vmem>>, %arg4: memref<1x16x128xbf16, #tpu.memory_space<vmem>>, %arg5: memref<128x128xbf16, #tpu.memory_space<vmem>>, %arg6: memref<128x128xbf16, #tpu.memory_space<vmem>>, %arg7: memref<128x128xbf16, #tpu.memory_space<vmem>>, %arg8: memref<4x32x128xbf16, #tpu.memory_space<vmem>>, %arg9: memref<1x128xf32, #tpu.memory_space<vmem>>, %arg10: memref<1x16x128xf32, #tpu.memory_space<vmem>>) attributes {dimension_semantics = [#tpu.dimension_semantics<parallel>, #tpu.dimension_semantics<parallel>], iteration_bounds = array<i64: 2, 1>, scalar_prefetch = 0 : i64, scratch_operands = 0 : i64, tpu.core_type = #tpu.core_type<tc>, window_params = [{transform_indices = @transform_0, window_bounds = array<i64: 1, 16, 128>}, {transform_indices = @transform_1, window_bounds = array<i64: 1, 16, 128>}, {transform_indices = @transform_2, window_bounds = array<i64: 1, 16, 128>}, {pipeline_mode = #tpu.pipeline_mode<synchronous>, transform_indices = @transform_3, window_bounds = array<i64: 128, 128>}, {pipeline_mode = #tpu.pipeline_mode<synchronous>, transform_indices = @transform_4, window_bounds = array<i64: 128, 128>}, {pipeline_mode = #tpu.pipeline_mode<synchronous>, transform_indices = @transform_5, window_bounds = array<i64: 128, 128>}, {pipeline_mode = #tpu.pipeline_mode<synchronous>, transform_indices = @transform_6, window_bounds = array<i64: 4, 32, 128>}, {pipeline_mode = #tpu.pipeline_mode<synchronous>, transform_indices = @transform_7, window_bounds = array<i64: 1, 128>}, {transform_indices = @transform_8, window_bounds = array<i64: 1, 16, 128>}]} {
    %c0 = arith.constant 0 : index
    %c0_0 = arith.constant 0 : index
    %c0_1 = arith.constant 0 : index
    %0 = vector.load %arg2[%c0, %c0_0, %c0_1] : memref<1x16x128xbf16, #tpu.memory_space<vmem>>, vector<1x16x128xbf16>
    %1 = vector.shape_cast %0 : vector<1x16x128xbf16> to vector<16x128xbf16>
    %c0_2 = arith.constant 0 : index
    %c0_3 = arith.constant 0 : index
    %c0_4 = arith.constant 0 : index
    %2 = vector.load %arg3[%c0_2, %c0_3, %c0_4] : memref<1x16x128xbf16, #tpu.memory_space<vmem>>, vector<1x16x128xbf16>
    %3 = vector.shape_cast %2 : vector<1x16x128xbf16> to vector<16x128xbf16>
    %c0_5 = arith.constant 0 : index
    %c0_6 = arith.constant 0 : index
    %c0_7 = arith.constant 0 : index
    %4 = vector.load %arg4[%c0_5, %c0_6, %c0_7] : memref<1x16x128xbf16, #tpu.memory_space<vmem>>, vector<1x16x128xbf16>
    %5 = vector.shape_cast %4 : vector<1x16x128xbf16> to vector<16x128xbf16>
    %c0_8 = arith.constant 0 : index
    %c0_9 = arith.constant 0 : index
    %6 = vector.load %arg5[%c0_8, %c0_9] : memref<128x128xbf16, #tpu.memory_space<vmem>>, vector<128x128xbf16>
    %cst = arith.constant dense<0.000000e+00> : vector<16x128xf32>
    %7 = tpu.matmul %1, %6, %cst {dimension_numbers = #tpu.dot_dimension_numbers<[1], [0], [0], [1], [0, 0, 1, 1], [], []>} : vector<16x128xbf16>, vector<128x128xbf16>, vector<16x128xf32> -> vector<16x128xf32>
    %cst_10 = arith.constant 0.176776692 : f32
    %8 = vector.broadcast %cst_10 : f32 to vector<16x128xf32>
    %9 = arith.mulf %7, %8 : vector<16x128xf32>
    %c0_11 = arith.constant 0 : index
    %c0_12 = arith.constant 0 : index
    %10 = vector.load %arg6[%c0_11, %c0_12] : memref<128x128xbf16, #tpu.memory_space<vmem>>, vector<128x128xbf16>
    %cst_13 = arith.constant dense<0.000000e+00> : vector<16x128xf32>
    %11 = tpu.matmul %3, %10, %cst_13 {dimension_numbers = #tpu.dot_dimension_numbers<[1], [0], [0], [1], [0, 0, 1, 1], [], []>} : vector<16x128xbf16>, vector<128x128xbf16>, vector<16x128xf32> -> vector<16x128xf32>
    %c0_14 = arith.constant 0 : index
    %c0_15 = arith.constant 0 : index
    %12 = vector.load %arg7[%c0_14, %c0_15] : memref<128x128xbf16, #tpu.memory_space<vmem>>, vector<128x128xbf16>
    %cst_16 = arith.constant dense<0.000000e+00> : vector<16x128xf32>
    %13 = tpu.matmul %5, %12, %cst_16 {dimension_numbers = #tpu.dot_dimension_numbers<[1], [0], [0], [1], [0, 0, 1, 1], [], []>} : vector<16x128xbf16>, vector<128x128xbf16>, vector<16x128xf32> -> vector<16x128xf32>
    %14 = arith.truncf %9 : vector<16x128xf32> to vector<16x128xbf16>
    %15 = vector.shape_cast %14 : vector<16x128xbf16> to vector<16x4x32xbf16>
    %16 = tpu.transpose %15, [1, 0, 2] : vector<16x4x32xbf16> -> vector<4x16x32xbf16>
    %17 = arith.truncf %11 : vector<16x128xf32> to vector<16x128xbf16>
    %18 = vector.shape_cast %17 : vector<16x128xbf16> to vector<16x4x32xbf16>
    %19 = tpu.transpose %18, [1, 0, 2] : vector<16x4x32xbf16> -> vector<4x16x32xbf16>
    %20 = arith.truncf %13 : vector<16x128xf32> to vector<16x128xbf16>
    %21 = vector.shape_cast %20 : vector<16x128xbf16> to vector<16x4x32xbf16>
    %22 = tpu.transpose %21, [1, 0, 2] : vector<16x4x32xbf16> -> vector<4x16x32xbf16>
    "tpu.trace_start"() <{level = 10 : i32, message = "hqd,hkd->hqk"}> : () -> ()
    %cst_17 = arith.constant dense<0.000000e+00> : vector<4x16x16xf32>
    %23 = tpu.matmul %16, %19, %cst_17 {dimension_numbers = #tpu.dot_dimension_numbers<[2], [2], [1], [1], [0, 0, 0, 1, 1, 1], [0], [0]>} : vector<4x16x32xbf16>, vector<4x16x32xbf16>, vector<4x16x16xf32> -> vector<4x16x16xf32>
    "tpu.trace_stop"() : () -> ()
    %cst_18 = arith.constant dense<0xFF800000> : vector<4x16xf32>
    %24 = vector.multi_reduction <maximumf>, %23, %cst_18 [2] : vector<4x16x16xf32> to vector<4x16xf32>
    %25 = vector.shape_cast %24 : vector<4x16xf32> to vector<4x16x1xf32>
    %26 = vector.broadcast %25 : vector<4x16x1xf32> to vector<4x16x16xf32>
    %27 = arith.subf %23, %26 : vector<4x16x16xf32>
    %28 = math.exp %27 : vector<4x16x16xf32>
    %cst_19 = arith.constant dense<0.000000e+00> : vector<4x16xf32>
    %29 = vector.multi_reduction <add>, %28, %cst_19 [2] : vector<4x16x16xf32> to vector<4x16xf32>
    %30 = vector.shape_cast %29 : vector<4x16xf32> to vector<4x16x1xf32>
    %31 = tpu.reciprocal %30 : vector<4x16x1xf32> -> vector<4x16x1xf32>
    %32 = arith.truncf %28 : vector<4x16x16xf32> to vector<4x16x16xbf16>
    "tpu.trace_start"() <{level = 10 : i32, message = "hqk,hkd->hqd"}> : () -> ()
    %cst_20 = arith.constant dense<0.000000e+00> : vector<4x16x32xf32>
    %33 = tpu.matmul %32, %22, %cst_20 {dimension_numbers = #tpu.dot_dimension_numbers<[2], [1], [1], [2], [0, 0, 0, 1, 1, 2], [0], [0]>} : vector<4x16x16xbf16>, vector<4x16x32xbf16>, vector<4x16x32xf32> -> vector<4x16x32xf32>
    "tpu.trace_stop"() : () -> ()
    %34 = vector.broadcast %31 : vector<4x16x1xf32> to vector<4x16x32xf32>
    %35 = arith.mulf %33, %34 : vector<4x16x32xf32>
    %36 = arith.truncf %35 : vector<4x16x32xf32> to vector<4x16x32xbf16>
    %c0_21 = arith.constant 0 : index
    %c0_22 = arith.constant 0 : index
    %c0_23 = arith.constant 0 : index
    %37 = vector.load %arg8[%c0_21, %c0_22, %c0_23] : memref<4x32x128xbf16, #tpu.memory_space<vmem>>, vector<4x32x128xbf16>
    "tpu.trace_start"() <{level = 10 : i32, message = "hqd,hdm->hqm"}> : () -> ()
    %cst_24 = arith.constant dense<0.000000e+00> : vector<4x16x128xf32>
    %38 = tpu.matmul %36, %37, %cst_24 {dimension_numbers = #tpu.dot_dimension_numbers<[2], [1], [1], [2], [0, 0, 0, 1, 1, 2], [0], [0]>} : vector<4x16x32xbf16>, vector<4x32x128xbf16>, vector<4x16x128xf32> -> vector<4x16x128xf32>
    "tpu.trace_stop"() : () -> ()
    %cst_25 = arith.constant dense<0.000000e+00> : vector<16x128xf32>
    %39 = vector.multi_reduction <add>, %38, %cst_25 [0] : vector<4x16x128xf32> to vector<16x128xf32>
    %c0_26 = arith.constant 0 : index
    %c0_27 = arith.constant 0 : index
    %40 = vector.load %arg9[%c0_26, %c0_27] : memref<1x128xf32, #tpu.memory_space<vmem>>, vector<1x128xf32>
    %41 = vector.broadcast %40 : vector<1x128xf32> to vector<16x128xf32>
    %42 = arith.addf %39, %41 : vector<16x128xf32>
    %c0_28 = arith.constant 0 : index
    %c0_29 = arith.constant 0 : index
    %c0_30 = arith.constant 0 : index
    %43 = vector.load %arg10[%c0_28, %c0_29, %c0_30] : memref<1x16x128xf32, #tpu.memory_space<vmem>>, vector<1x16x128xf32>
    %44 = vector.shape_cast %43 : vector<1x16x128xf32> to vector<16x128xf32>
    %45 = vector.shape_cast %42 : vector<16x128xf32> to vector<1x16x128xf32>
    tpu.vector_store %arg10[%c0_28, %c0_29, %c0_30], %45 {strides = array<i32>} : memref<1x16x128xf32, #tpu.memory_space<vmem>>, vector<1x16x128xf32>,
    return
  }
  func.func @transform_0(%arg0: i32, %arg1: i32) -> (i32, i32, i32) {
    %c0_i32 = arith.constant 0 : i32
    %c0_i32_0 = arith.constant 0 : i32
    return %arg0, %arg1, %c0_i32 : i32, i32, i32
  }
  func.func @transform_1(%arg0: i32, %arg1: i32) -> (i32, i32, i32) {
    %c0_i32 = arith.constant 0 : i32
    %c0_i32_0 = arith.constant 0 : i32
    %c0_i32_1 = arith.constant 0 : i32
    return %arg0, %c0_i32, %c0_i32_0 : i32, i32, i32
  }
  func.func @transform_2(%arg0: i32, %arg1: i32) -> (i32, i32, i32) {
    %c0_i32 = arith.constant 0 : i32
    %c0_i32_0 = arith.constant 0 : i32
    %c0_i32_1 = arith.constant 0 : i32
    return %arg0, %c0_i32, %c0_i32_0 : i32, i32, i32
  }
  func.func @transform_3(%arg0: i32, %arg1: i32) -> (i32, i32) {
    %c0_i32 = arith.constant 0 : i32
    %c0_i32_0 = arith.constant 0 : i32
    %c0_i32_1 = arith.constant 0 : i32
    return %c0_i32, %c0_i32_0 : i32, i32
  }
  func.func @transform_4(%arg0: i32, %arg1: i32) -> (i32, i32) {
    %c0_i32 = arith.constant 0 : i32
    %c0_i32_0 = arith.constant 0 : i32
    %c0_i32_1 = arith.constant 0 : i32
    return %c0_i32, %c0_i32_0 : i32, i32
  }
  func.func @transform_5(%arg0: i32, %arg1: i32) -> (i32, i32) {
    %c0_i32 = arith.constant 0 : i32
    %c0_i32_0 = arith.constant 0 : i32
    %c0_i32_1 = arith.constant 0 : i32
    return %c0_i32, %c0_i32_0 : i32, i32
  }
  func.func @transform_6(%arg0: i32, %arg1: i32) -> (i32, i32, i32) {
    %c0_i32 = arith.constant 0 : i32
    %c0_i32_0 = arith.constant 0 : i32
    %c0_i32_1 = arith.constant 0 : i32
    %c0_i32_2 = arith.constant 0 : i32
    return %c0_i32, %c0_i32_0, %c0_i32_1 : i32, i32, i32
  }
  func.func @transform_7(%arg0: i32, %arg1: i32) -> (i32, i32) {
    %c0_i32 = arith.constant 0 : i32
    %c0_i32_0 = arith.constant 0 : i32
    %c0_i32_1 = arith.constant 0 : i32
    return %c0_i32, %c0_i32_0 : i32, i32
  }
  func.func @transform_8(%arg0: i32, %arg1: i32) -> (i32, i32, i32) {
    %c0_i32 = arith.constant 0 : i32
    %c0_i32_0 = arith.constant 0 : i32
    return %arg0, %arg1, %c0_i32 : i32, i32, i32
  }
}

module attributes {stable_mosaic.version = 11 : i64} {
  func.func @_attention_kernel(%arg0: i32, %arg1: i32, %arg2: memref<1x16x128xbf16, #tpu.memory_space<vmem>>, %arg3: memref<1x16x128xbf16, #tpu.memory_space<vmem>>, %arg4: memref<1x16x128xbf16, #tpu.memory_space<vmem>>, %arg5: memref<128x128xbf16, #tpu.memory_space<vmem>>, %arg6: memref<128x128xbf16, #tpu.memory_space<vmem>>, %arg7: memref<128x128xbf16, #tpu.memory_space<vmem>>, %arg8: memref<4x32x128xbf16, #tpu.memory_space<vmem>>, %arg9: memref<1x128xf32, #tpu.memory_space<vmem>>, %arg10: memref<1x16x128xf32, #tpu.memory_space<vmem>>) attributes {dimension_semantics = [#tpu.dimension_semantics<parallel>, #tpu.dimension_semantics<parallel>], iteration_bounds = array<i64: 2, 1>, scalar_prefetch = 0 : i64, scratch_operands = 0 : i64, tpu.core_type = #tpu.core_type<tc>, window_params = [{transform_indices = @transform_0, window_bounds = array<i64: 1, 16, 128>}, {transform_indices = @transform_1, window_bounds = array<i64: 1, 16, 128>}, {transform_indices = @transform_2, window_bounds = array<i64: 1, 16, 128>}, {pipeline_mode = #tpu.pipeline_mode<synchronous>, transform_indices = @transform_3, window_bounds = array<i64: 128, 128>}, {pipeline_mode = #tpu.pipeline_mode<synchronous>, transform_indices = @transform_4, window_bounds = array<i64: 128, 128>}, {pipeline_mode = #tpu.pipeline_mode<synchronous>, transform_indices = @transform_5, window_bounds = array<i64: 128, 128>}, {pipeline_mode = #tpu.pipeline_mode<synchronous>, transform_indices = @transform_6, window_bounds = array<i64: 4, 32, 128>}, {pipeline_mode = #tpu.pipeline_mode<synchronous>, transform_indices = @transform_7, window_bounds = array<i64: 1, 128>}, {transform_indices = @transform_8, window_bounds = array<i64: 1, 16, 128>}]} {
    %c0 = arith.constant 0 : index
    %c0_0 = arith.constant 0 : index
    %c0_1 = arith.constant 0 : index
    %0 = vector.load %arg2[%c0, %c0_0, %c0_1] : memref<1x16x128xbf16, #tpu.memory_space<vmem>>, vector<1x16x128xbf16>
    %1 = vector.shape_cast %0 : vector<1x16x128xbf16> to vector<16x128xbf16>
    %c0_2 = arith.constant 0 : index
    %c0_3 = arith.constant 0 : index
    %c0_4 = arith.constant 0 : index
    %2 = vector.load %arg3[%c0_2, %c0_3, %c0_4] : memref<1x16x128xbf16, #tpu.memory_space<vmem>>, vector<1x16x128xbf16>
    %3 = vector.shape_cast %2 : vector<1x16x128xbf16> to vector<16x128xbf16>
    %c0_5 = arith.constant 0 : index
    %c0_6 = arith.constant 0 : index
    %c0_7 = arith.constant 0 : index
    %4 = vector.load %arg4[%c0_5, %c0_6, %c0_7] : memref<1x16x128xbf16, #tpu.memory_space<vmem>>, vector<1x16x128xbf16>
    %5 = vector.shape_cast %4 : vector<1x16x128xbf16> to vector<16x128xbf16>
    %c0_8 = arith.constant 0 : index
    %c0_9 = arith.constant 0 : index
    %6 = vector.load %arg5[%c0_8, %c0_9] : memref<128x128xbf16, #tpu.memory_space<vmem>>, vector<128x128xbf16>
    %cst = arith.constant dense<0.000000e+00> : vector<16x128xf32>
    %7 = tpu.matmul %1, %6, %cst {dimension_numbers = #tpu.dot_dimension_numbers<[1], [0], [0], [1], [0, 0, 1, 1], [], []>} : vector<16x128xbf16>, vector<128x128xbf16>, vector<16x128xf32> -> vector<16x128xf32>
    %cst_10 = arith.constant 0.176776692 : f32
    %8 = vector.broadcast %cst_10 : f32 to vector<16x128xf32>
    %9 = arith.mulf %7, %8 : vector<16x128xf32>
    %c0_11 = arith.constant 0 : index
    %c0_12 = arith.constant 0 : index
    %10 = vector.load %arg6[%c0_11, %c0_12] : memref<128x128xbf16, #tpu.memory_space<vmem>>, vector<128x128xbf16>
    %cst_13 = arith.constant dense<0.000000e+00> : vector<16x128xf32>
    %11 = tpu.matmul %3, %10, %cst_13 {dimension_numbers = #tpu.dot_dimension_numbers<[1], [0], [0], [1], [0, 0, 1, 1], [], []>} : vector<16x128xbf16>, vector<128x128xbf16>, vector<16x128xf32> -> vector<16x128xf32>
    %c0_14 = arith.constant 0 : index
    %c0_15 = arith.constant 0 : index
    %12 = vector.load %arg7[%c0_14, %c0_15] : memref<128x128xbf16, #tpu.memory_space<vmem>>, vector<128x128xbf16>
    %cst_16 = arith.constant dense<0.000000e+00> : vector<16x128xf32>
    %13 = tpu.matmul %5, %12, %cst_16 {dimension_numbers = #tpu.dot_dimension_numbers<[1], [0], [0], [1], [0, 0, 1, 1], [], []>} : vector<16x128xbf16>, vector<128x128xbf16>, vector<16x128xf32> -> vector<16x128xf32>
    %14 = arith.truncf %9 : vector<16x128xf32> to vector<16x128xbf16>
    %15 = vector.shape_cast %14 : vector<16x128xbf16> to vector<16x4x32xbf16>
    %16 = tpu.transpose %15, [1, 0, 2] : vector<16x4x32xbf16> -> vector<4x16x32xbf16>
    %17 = arith.truncf %11 : vector<16x128xf32> to vector<16x128xbf16>
    %18 = vector.shape_cast %17 : vector<16x128xbf16> to vector<16x4x32xbf16>
    %19 = tpu.transpose %18, [1, 0, 2] : vector<16x4x32xbf16> -> vector<4x16x32xbf16>
    %20 = arith.truncf %13 : vector<16x128xf32> to vector<16x128xbf16>
    %21 = vector.shape_cast %20 : vector<16x128xbf16> to vector<16x4x32xbf16>
    %22 = tpu.transpose %21, [1, 0, 2] : vector<16x4x32xbf16> -> vector<4x16x32xbf16>
    "tpu.trace_start"() <{level = 10 : i32, message = "hqd,hkd->hqk"}> : () -> ()
    %cst_17 = arith.constant dense<0.000000e+00> : vector<4x16x16xf32>
    %23 = tpu.matmul %16, %19, %cst_17 {dimension_numbers = #tpu.dot_dimension_numbers<[2], [2], [1], [1], [0, 0, 0, 1, 1, 1], [0], [0]>} : vector<4x16x32xbf16>, vector<4x16x32xbf16>, vector<4x16x16xf32> -> vector<4x16x16xf32>
    "tpu.trace_stop"() : () -> ()
    %cst_18 = arith.constant dense<0xFF800000> : vector<4x16xf32>
    %24 = vector.multi_reduction <maximumf>, %23, %cst_18 [2] : vector<4x16x16xf32> to vector<4x16xf32>
    %25 = vector.shape_cast %24 : vector<4x16xf32> to vector<4x16x1xf32>
    %26 = vector.broadcast %25 : vector<4x16x1xf32> to vector<4x16x16xf32>
    %27 = arith.subf %23, %26 : vector<4x16x16xf32>
    %28 = math.exp %27 : vector<4x16x16xf32>
    %cst_19 = arith.constant dense<0.000000e+00> : vector<4x16xf32>
    %29 = vector.multi_reduction <add>, %28, %cst_19 [2] : vector<4x16x16xf32> to vector<4x16xf32>
    %30 = vector.shape_cast %29 : vector<4x16xf32> to vector<4x16x1xf32>
    %31 = tpu.reciprocal %30 : vector<4x16x1xf32> -> vector<4x16x1xf32>
    %32 = arith.truncf %28 : vector<4x16x16xf32> to vector<4x16x16xbf16>
    "tpu.trace_start"() <{level = 10 : i32, message = "hqk,hkd->hqd"}> : () -> ()
    %cst_20 = arith.constant dense<0.000000e+00> : vector<4x16x32xf32>
    %33 = tpu.matmul %32, %22, %cst_20 {dimension_numbers = #tpu.dot_dimension_numbers<[2], [1], [1], [2], [0, 0, 0, 1, 1, 2], [0], [0]>} : vector<4x16x16xbf16>, vector<4x16x32xbf16>, vector<4x16x32xf32> -> vector<4x16x32xf32>
    "tpu.trace_stop"() : () -> ()
    %34 = vector.broadcast %31 : vector<4x16x1xf32> to vector<4x16x32xf32>
    %35 = arith.mulf %33, %34 : vector<4x16x32xf32>
    %36 = arith.truncf %35 : vector<4x16x32xf32> to vector<4x16x32xbf16>
    %c0_21 = arith.constant 0 : index
    %c0_22 = arith.constant 0 : index
    %c0_23 = arith.constant 0 : index
    %37 = vector.load %arg8[%c0_21, %c0_22, %c0_23] : memref<4x32x128xbf16, #tpu.memory_space<vmem>>, vector<4x32x128xbf16>
    "tpu.trace_start"() <{level = 10 : i32, message = "hqd,hdm->hqm"}> : () -> ()
    %cst_24 = arith.constant dense<0.000000e+00> : vector<4x16x128xf32>
    %38 = tpu.matmul %36, %37, %cst_24 {dimension_numbers = #tpu.dot_dimension_numbers<[2], [1], [1], [2], [0, 0, 0, 1, 1, 2], [0], [0]>} : vector<4x16x32xbf16>, vector<4x32x128xbf16>, vector<4x16x128xf32> -> vector<4x16x128xf32>
    "tpu.trace_stop"() : () -> ()
    %cst_25 = arith.constant dense<0.000000e+00> : vector<16x128xf32>
    %39 = vector.multi_reduction <add>, %38, %cst_25 [0] : vector<4x16x128xf32> to vector<16x128xf32>
    %c0_26 = arith.constant 0 : index
    %c0_27 = arith.constant 0 : index
    %40 = vector.load %arg9[%c0_26, %c0_27] : memref<1x128xf32, #tpu.memory_space<vmem>>, vector<1x128xf32>
    %41 = vector.broadcast %40 : vector<1x128xf32> to vector<16x128xf32>
    %42 = arith.addf %39, %41 : vector<16x128xf32>
    %c0_28 = arith.constant 0 : index
    %c0_29 = arith.constant 0 : index
    %c0_30 = arith.constant 0 : index
    %43 = vector.load %arg10[%c0_28, %c0_29, %c0_30] : memref<1x16x128xf32, #tpu.memory_space<vmem>>, vector<1x16x128xf32>
    %44 = vector.shape_cast %43 : vector<1x16x128xf32> to vector<16x128xf32>
    %45 = vector.shape_cast %42 : vector<16x128xf32> to vector<1x16x128xf32>
    tpu.vector_store %arg10[%c0_28, %c0_29, %c0_30], %45 {strides = array<i32>} : memref<1x16x128xf32, #tpu.memory_space<vmem>>, vector<1x16x128xf32>,
    return
  }
  func.func @transform_0(%arg0: i32, %arg1: i32) -> (i32, i32, i32) {
    %c0_i32 = arith.constant 0 : i32
    %c0_i32_0 = arith.constant 0 : i32
    return %arg0, %arg1, %c0_i32 : i32, i32, i32
  }
  func.func @transform_1(%arg0: i32, %arg1: i32) -> (i32, i32, i32) {
    %c0_i32 = arith.constant 0 : i32
    %c0_i32_0 = arith.constant 0 : i32
    %c0_i32_1 = arith.constant 0 : i32
    return %arg0, %c0_i32, %c0_i32_0 : i32, i32, i32
  }
  func.func @transform_2(%arg0: i32, %arg1: i32) -> (i32, i32, i32) {
    %c0_i32 = arith.constant 0 : i32
    %c0_i32_0 = arith.constant 0 : i32
    %c0_i32_1 = arith.constant 0 : i32
    return %arg0, %c0_i32, %c0_i32_0 : i32, i32, i32
  }
  func.func @transform_3(%arg0: i32, %arg1: i32) -> (i32, i32) {
    %c0_i32 = arith.constant 0 : i32
    %c0_i32_0 = arith.constant 0 : i32
    %c0_i32_1 = arith.constant 0 : i32
    return %c0_i32, %c0_i32_0 : i32, i32
  }
  func.func @transform_4(%arg0: i32, %arg1: i32) -> (i32, i32) {
    %c0_i32 = arith.constant 0 : i32
    %c0_i32_0 = arith.constant 0 : i32
    %c0_i32_1 = arith.constant 0 : i32
    return %c0_i32, %c0_i32_0 : i32, i32
  }
  func.func @transform_5(%arg0: i32, %arg1: i32) -> (i32, i32) {
    %c0_i32 = arith.constant 0 : i32
    %c0_i32_0 = arith.constant 0 : i32
    %c0_i32_1 = arith.constant 0 : i32
    return %c0_i32, %c0_i32_0 : i32, i32
  }
  func.func @transform_6(%arg0: i32, %arg1: i32) -> (i32, i32, i32) {
    %c0_i32 = arith.constant 0 : i32
    %c0_i32_0 = arith.constant 0 : i32
    %c0_i32_1 = arith.constant 0 : i32
    %c0_i32_2 = arith.constant 0 : i32
    return %c0_i32, %c0_i32_0, %c0_i32_1 : i32, i32, i32
  }
  func.func @transform_7(%arg0: i32, %arg1: i32) -> (i32, i32) {
    %c0_i32 = arith.constant 0 : i32
    %c0_i32_0 = arith.constant 0 : i32
    %c0_i32_1 = arith.constant 0 : i32
    return %c0_i32, %c0_i32_0 : i32, i32
  }
  func.func @transform_8(%arg0: i32, %arg1: i32) -> (i32, i32, i32) {
    %c0_i32 = arith.constant 0 : i32
    %c0_i32_0 = arith.constant 0 : i32
    return %arg0, %arg1, %c0_i32 : i32, i32, i32
  }
}

</mosaic_0001>

<bundles_post_ra>
// kernel: tpu_custom_call.1
= control target key start
LH: loop header
LB: loop body
LE: loop exit
PB: predicated region body
PF: predicated region fallthrough
CT: control target
= control target key end

     0   :  { %s3887_s0 = inlined_call_operand.hbm [shape: bf16[2,16,128], index: 0, kind: input, shape index: {}]   ;;  %s3888_s1 = inlined_call_operand.hbm [shape: bf16[2,16,128], index: 1, kind: input, shape index: {}]   ;;  %s3889_s2 = inlined_call_operand.hbm [shape: bf16[2,16,128], index: 2, kind: input, shape index: {}]   ;;  %s3890_s3 = inlined_call_operand.hbm [shape: bf16[128,128], index: 3, kind: input, shape index: {}]   ;;  %s3891_s4 = inlined_call_operand.hbm [shape: bf16[128,128], index: 4, kind: input, shape index: {}]   ;;  %s3892_s5 = inlined_call_operand.hbm [shape: bf16[128,128], index: 5, kind: input, shape index: {}]   ;;  %s3893_s6 = inlined_call_operand.hbm [shape: bf16[4,32,128], index: 6, kind: input, shape index: {}]   ;;  %s3894_s7 = inlined_call_operand.vmem [shape: f32[1,128], index: 7, kind: input, shape index: {}]   ;;  %s3895_s8 = inlined_call_operand.hbm [shape: f32[2,16,128], index: 8, kind: output, shape index: {}]  }
   0x1   :  { %3910 = sst [smem:[#allocation26_spill]] %s3888_s1 }
   0x2   :  { %3911 = sst [smem:[#allocation27_spill]] %s3890_s3 }
   0x3   :  { %3912 = sst [smem:[#allocation28_spill]] %s3891_s4 }
   0x4   :  { %3913 = sst [smem:[#allocation29_spill]] %s3892_s5 }
   0x5   :  { %13 = vsyncpa [#allocation3], 0 }
   0x6   :  { %15 = vsyncpa [#allocation3 + $0x1], 0 }
   0x7   :  { %16 = vsyncpa [#allocation6], 0 }
   0x8   :  { %18 = vsyncpa [#allocation6 + $0x1], 0 }
   0x9   :  { %19 = vsyncpa [#allocation9], 0 }
   0xa   :  { %20 = vsyncpa [#allocation12], 0 }
   0xb   :  { %21 = vsyncpa [#allocation4], 0 }
   0xc   :  { %23 = vsyncpa [#allocation4 + $0x1], 0  ;;  %s3367_s27 = smov 0   ;;  %s3369_s28 = smov 0  }
   0xd   :  { %s3371_s29 = smov 0   ;;  %s3373_s30 = smov 0  }
   0xe   :  { %s3375_s9 = smov 0   ;;  %s3377_s10 = smov 0  }
   0xf LB: > { %3914 = sst [smem:[#allocation20_spill]] %s3280_s27  ;;  %s3398_s11 = sadd.s32 4294967295, %s3300_s10   ;;  %s3300_s10 = sphi %s3377_s10, %s29_s10   ;;  %s3296_s9 = sphi %s3375_s9, %s3948_s9   ;;  %s3292_s30 = sphi %s3373_s30, %s3947_s30   ;;  %s3288_s29 = sphi %s3371_s29, %s3951_s29   ;;  %s3284_s28 = sphi %s3369_s28, %s3950_s28   ;;  %s3280_s27 = sphi %s3367_s27, %s3949_s27  }
  0x10   : > { %3915 = sst [smem:[#allocation21_spill]] %s3296_s9  ;;  %s2539_s12 = sadd.s32 4294967294, %s3300_s10  }
  0x11   : > { %3916 = sst [smem:[#allocation22_spill]] %s3300_s10  ;;  %p63_p0 = scmp.ne.s32.totalorder %s3284_s28, %s3280_s27 }
  0x12   : > { %p3896_p1 = scmp.eq.s32.totalorder %s3398_s11, 0  ;;  %p246_p2 = scmp.eq.s32.totalorder %s3398_s11, 1 }
  0x13   : > { %p252_p3 = scmp.eq.s32.totalorder %s2539_s12, 1  ;;  %p2540_p5 = scmp.ge.s32.totalorder %s3300_s10, 1 }
  0x14   : > { %p3407_p4 = por %p3896_p1, %p63_p0  ;;  %p259_p7 = scmp.lt.s32.totalorder %s3300_s10, 3 }
  0x15   : > { %p3412_p6 = por %p252_p3, %p63_p0  ;;  %s3302_s16 = smov [#allocation8]  }
  0x16   : > { %p3417_p8 = pnand %p2540_p5, %p259_p7  ;;  %s271_s17 = sshll.u32 %s3302_s16, 4  ;;  %s272_s17 = int_to_ptr.vmem [resolvable:$true] %s271_s17 }
  0x17   : > { %s3918_s14 = scalar_select %p3412_p6, 1, 0 }
  0x18   : > { %p2852_p9 = pneg %p3417_p8  ;;  %s3303_s19 = smov [#allocation11]  }
  0x19   : > { %3919 = sst [smem:[#allocation23_spill]] %s3918_s14  ;;  %s297_s20 = sshll.u32 %s3303_s19, 4  ;;  %s298_s20 = int_to_ptr.vmem [resolvable:$true] %s297_s20 }
  0x1a   : > { %p3426_p11 = pnand %p2852_p9, %p3896_p1  ;;  %s3031_s21 = scalar_lea.vmem %s272_s17, 1024 }
  0x1b   : > { %p3032_p13 = scmp.ne.s32.totalorder %s272_s17, %s3031_s21  ;;  %p3039_p5 = scmp.lt.s32.totalorder %s272_s17, %s272_s17 }
  0x1c   : > { %p3906_p12 = pneg %p3426_p11  ;;  %p3040_p7 = scmp.lt.s32.totalorder %s3031_s21, %s3031_s21 }
  0x1e   : > { %p3034_p0 = pnand %p3032_p13, %p3906_p12  ;;  %p3041_p10 = por %p3040_p7, %p3039_p5 }
  0x20   : > { %p3035_p3 = pneg %p3034_p0 }
  0x22   : > { %p3042_p9 = pnand %p3041_p10, %p3035_p3 }
  0x24   : > { %3045 = shalt.err (!%p3042_p9)
}
  0x25   : > { %s3897_s22 = smov 64   ;;  %s3899_s23 = smov 4  }
  0x26   : > { %s3922_s3 = sld [smem:[#allocation27_spill]]  ;;  %s3057_s26 = scalar_lea.vmem %s298_s20, 1024 }
  0x27   : > { %p3058_p13 = scmp.ne.s32.totalorder %s298_s20, %s3057_s26  ;;  %p3065_p10 = scmp.lt.s32.totalorder %s298_s20, %s298_s20 }
  0x28   : > { %p3066_p3 = scmp.lt.s32.totalorder %s3057_s26, %s3057_s26 }
  0x29   : > { %p3060_p0 = pnand %p3058_p13, %p3906_p12 }
  0x2a   : > { %p3067_p7 = por %p3066_p3, %p3065_p10 }
  0x2b   : > { %p3061_p5 = pneg %p3060_p0 }
  0x2c   : > { %2855 = dma.hbm_to_vmem [thread:$0]  (!%p3426_p11), %s3922_s3, 1024, %s272_s17, [#allocation9], %s3897_s22, %s3897_s22, %s3899_s23  }
  0x2d   : > { %p3068_p9 = pnand %p3067_p7, %p3061_p5 }
  0x2f   : > { %3071 = shalt.err (!%p3068_p9)
}
  0x30   : > { %s3923_s5 = sld [smem:[#allocation29_spill]]  ;;  %s41_s17 = sadd.s32 1, %s3296_s9 }
  0x31   : > { %s50_s19 = sadd.s32 1, %s3288_s29  ;;  %p43_p13 = scmp.ge.s32.totalorder %s41_s17, 2 }
  0x32   : > { %p57_p0 = scmp.ne.s32.totalorder %s3288_s29, %s3284_s28  ;;  %p58_p5 = scmp.eq.s32.totalorder %s3300_s10, 0 }
  0x33   : > { %p2883_p10 = scmp.lt.s32.totalorder %s3300_s10, 2  ;;  %s3953_s17 = smov (%p43_p13, %s41_s17), 0 }
  0x34   : > { %3924 = sst [smem:[#allocation24_spill]] %s3953_s17  ;;  %p59_p3 = por %p58_p5, %p57_p0 }
  0x35   : > { %p3464_p7 = por %p246_p2, %p57_p0  ;;  %s45_s24 = ssub.s32 %s3296_s9, %s3953_s17 }
  0x36   : > { %2861 = dma.hbm_to_vmem [thread:$0]  (!%p3426_p11), %s3923_s5, 1024, %s298_s20, [#allocation12], %s3897_s22, %s3897_s22, %s3899_s23  }
  0x37   : > { %s3901_s25 = sand.u32 1, %s3288_s29   ;;  %p48_p9 = scmp.eq.s32.totalorder %s45_s24, 0 }
  0x38   : > { %s3473_s20 = sshll.u32 %s3901_s25, 3  ;;  %s3476_s26 = sshll.u32 %s3296_s9, 7 }
  0x39   : > { %p3478_p1 = pnand %p2883_p10, %p59_p3  ;;  %s350_s22 = sand.u32 1, %s3300_s10  }
  0x3a   : > { %s3483_s16 = scalar_select %p48_p9, %s3288_s29, %s50_s19  }
  0x3b   : > { %s3928_s1 = sld [smem:[#allocation26_spill]]  ;;  %s354_s5 = scalar_lea.vmem [#allocation5], %s3473_s20 }
  0x3c   : > { %3927 = sst [smem:[#allocation25_spill]] %s3483_s16  ;;  %s361_s25 = sshll.u32 %s354_s5, 4  ;;  %s362_s25 = int_to_ptr.vmem [resolvable:$true] %s361_s25 }
  0x3d   : > { %s3491_s17 = scalar_lea.sflag [#allocation6], %s350_s22  ;;  %p3908_p2 = pneg %p3478_p1 }
  0x3e   : > { %s3085_s9 = scalar_lea.vmem %s362_s25, 128  ;;  %s3306_s19 = smov [#allocation5]  }
  0x3f   : > { %p3086_p13 = scmp.ne.s32.totalorder %s362_s25, %s3085_s9  ;;  %s3090_s16 = sshll.u32 %s3306_s19, 4  ;;  %s3091_s16 = int_to_ptr.vmem [resolvable:$false] %s3090_s16 }
  0x40   : > { %s3092_s10 = scalar_lea.vmem %s3091_s16, 256  ;;  %p3093_p10 = scmp.lt.s32.totalorder %s362_s25, %s3091_s16 }
  0x41   : > { %s360_s24 = scalar_lea.hbm %s3928_s1, %s3476_s26  ;;  %p3088_p0 = pnand %p3086_p13, %p3908_p2 }
  0x42   : > { %p3094_p3 = scmp.lt.s32.totalorder %s3092_s10, %s3085_s9 }
  0x43   : > { %p3089_p5 = pneg %p3088_p0 }
  0x44   : > { %p3095_p9 = por %p3094_p3, %p3093_p10 }
  0x46   : > { %p3096_p12 = pnand %p3095_p9, %p3089_p5 }
  0x48   : > { %3099 = shalt.err (!%p3096_p12)
}
  0x49   : > { %s3929_s3 = smov 4   ;;  %s3930_s5 = smov 64  }
  0x4a   : > { %2871 = dma.hbm_to_vmem [thread:$0]  (!%p3478_p1), %s360_s24, 128, %s362_s25, %s3491_s17, %s3930_s5, %s3930_s5, %s3929_s3  }
  0x4b   : > { %s3307_s22 = smov [#allocation10]   ;;  %s3308_s1 = smov [#allocation13]  }
  0x4c   : > { %s284_s23 = sshll.u32 %s3307_s22, 4  ;;  %s310_s19 = sshll.u32 %s3308_s1, 4  ;;  %s285_s23 = int_to_ptr.vmem [resolvable:$true] %s284_s23  ;;  %s311_s19 = int_to_ptr.vmem [resolvable:$true] %s310_s19 }
  0x4d   : > { %s3111_s14 = scalar_lea.vmem %s285_s23, 1024  ;;  %p3931_p0 = pneg %p3426_p11 }
  0x4e   : > { %p3112_p13 = scmp.ne.s32.totalorder %s285_s23, %s3111_s14  ;;  %p3119_p12 = scmp.lt.s32.totalorder %s285_s23, %s285_s23 }
  0x4f   : > { %p3120_p3 = scmp.lt.s32.totalorder %s3111_s14, %s3111_s14 }
  0x50   : > { %p3114_p10 = pnand %p3112_p13, %p3931_p0 }
  0x51   : > { %p3121_p9 = por %p3120_p3, %p3119_p12 }
  0x52   : > { %p3115_p5 = pneg %p3114_p10 }
  0x54   : > { %p3122_p2 = pnand %p3121_p9, %p3115_p5 }
  0x56   : > { %3125 = shalt.err (!%p3122_p2)
}
  0x57   : > { %s3932_s4 = sld [smem:[#allocation28_spill]]  ;;  %s3137_s1 = scalar_lea.vmem %s311_s19, 1024 }
  0x58   : > { %p3138_p6 = scmp.ne.s32.totalorder %s311_s19, %s3137_s1  ;;  %p3933_p13 = pmov %p3931_p0 }
  0x59   : > { %p3145_p12 = scmp.lt.s32.totalorder %s311_s19, %s311_s19  ;;  %p3146_p5 = scmp.lt.s32.totalorder %s3137_s1, %s3137_s1 }
  0x5a   : > { %p3140_p0 = pnand %p3138_p6, %p3933_p13 }
  0x5b   : > { %p3147_p2 = por %p3146_p5, %p3145_p12 }
  0x5c   : > { %p3141_p10 = pneg %p3140_p0 }
  0x5d   : > { %2858 = dma.hbm_to_vmem [thread:$0]  (!%p3426_p11), %s3932_s4, 1024, %s285_s23, [#allocation9], %s3930_s5, %s3930_s5, %s3929_s3  }
  0x5e   : > { %p3148_p3 = pnand %p3147_p2, %p3141_p10 }
  0x60   : > { %3151 = shalt.err (!%p3148_p3)
}
  0x61   : > { %2864 = dma.hbm_to_vmem [thread:$0]  (!%p3426_p11), %s3893_s6, 1024, %s311_s19, [#allocation12], %s3930_s5, %s3930_s5, %s3929_s3  }
  0x62   : > { %s339_s22 = scalar_lea.hbm %s3887_s0, %s3476_s26  ;;  %s331_s23 = scalar_lea.vmem [#allocation2], %s3473_s20 }
  0x63   : > { %s340_s9 = sshll.u32 %s331_s23, 4  ;;  %s381_s1 = scalar_lea.hbm %s3889_s2, %s3476_s26  ;;  %s341_s9 = int_to_ptr.vmem [resolvable:$true] %s340_s9 }
  0x64   : > { %s3934_s4 = sand.u32 1, %s3288_s29   ;;  %s3165_s14 = scalar_lea.vmem %s341_s9, 128 }
  0x65   : > { %s328_s27 = scalar_lea.sflag [#allocation3], %s3934_s4  ;;  %p3166_p6 = scmp.ne.s32.totalorder %s341_s9, %s3165_s14 }
  0x66   : > { %p3935_p9 = pneg %p3478_p1  ;;  %s3309_s19 = smov [#allocation2]  }
  0x67   : > { %s3170_s25 = sshll.u32 %s3309_s19, 4  ;;  %s3171_s25 = int_to_ptr.vmem [resolvable:$false] %s3170_s25 }
  0x68   : > { %p3168_p13 = pnand %p3166_p6, %p3935_p9  ;;  %s3172_s16 = scalar_lea.vmem %s3171_s25, 256 }
  0x69   : > { %p3173_p11 = scmp.lt.s32.totalorder %s341_s9, %s3171_s25  ;;  %p3174_p10 = scmp.lt.s32.totalorder %s3172_s16, %s3165_s14 }
  0x6a   : > { %p3169_p0 = pneg %p3168_p13 }
  0x6b   : > { %p3175_p12 = por %p3174_p10, %p3173_p11 }
  0x6d   : > { %p3176_p5 = pnand %p3175_p12, %p3169_p0 }
  0x6f   : > { %3179 = shalt.err (!%p3176_p5)
}
  0x70   : > { %2868 = dma.hbm_to_vmem [thread:$0]  (!%p3478_p1), %s339_s22, 128, %s341_s9, %s328_s27, %s3930_s5, %s3930_s5, %s3929_s3  }
  0x71   : > { %s375_s4 = scalar_lea.vmem [#allocation7], %s3473_s20  ;;  %p3936_p3 = pmov %p3935_p9 }
  0x72   : > { %s382_s24 = sshll.u32 %s375_s4, 4  ;;  %s3310_s18 = smov [#allocation7]   ;;  %s383_s24 = int_to_ptr.vmem [resolvable:$true] %s382_s24 }
  0x73   : > { %s3193_s23 = scalar_lea.vmem %s383_s24, 128  ;;  %s3198_s10 = sshll.u32 %s3310_s18, 4  ;;  %s3199_s10 = int_to_ptr.vmem [resolvable:$false] %s3198_s10 }
  0x74   : > { %p3194_p2 = scmp.ne.s32.totalorder %s383_s24, %s3193_s23  ;;  %s3200_s14 = scalar_lea.vmem %s3199_s10, 256 }
  0x75   : > { %p3201_p13 = scmp.lt.s32.totalorder %s383_s24, %s3199_s10  ;;  %p3202_p0 = scmp.lt.s32.totalorder %s3200_s14, %s3193_s23 }
  0x76   : > { %p3196_p6 = pnand %p3194_p2, %p3936_p3 }
  0x77   : > { %p3203_p11 = por %p3202_p0, %p3201_p13 }
  0x78   : > { %p3197_p9 = pneg %p3196_p6 }
  0x7a   : > { %p3204_p10 = pnand %p3203_p11, %p3197_p9 }
  0x7c   : > { %3207 = shalt.err (!%p3204_p10)
}
  0x7d   : > { %2874 = dma.hbm_to_vmem [thread:$0]  (!%p3478_p1), %s381_s1, 128, %s383_s24, %s3491_s17, %s3930_s5, %s3930_s5, %s3929_s3  }
  0x7e   : > { %394 = sbr.rel (%p3417_p8) target bundleno = 1362 (0x552), region = 52  ;;  %s3563_s22 = sand.u32 (!%p3417_p8), 1, %s3284_s28  }
  0x7f   : > { %s3566_s12 = sshll.u32 (!%p3417_p8), %s3563_s22, 3  ;;  %s397_s9 = scalar_lea.sflag (!%p3417_p8), [#allocation3], %s3563_s22 }
  0x80   : > { %s400_s19 = scalar_lea.vmem (!%p3417_p8), [#allocation2], %s3566_s12 }
  0x83   : > { %3259 = dma.done.wait (%p3407_p4), %s397_s9, 128  }
  0x84   : > { %3261 = vsyncadd (%p3407_p4), %s397_s9, 4294967168  ;;  %s405_s15 = sand.u32 1, %s3398_s11   ;;  %s409_s26 = scalar_lea.vmem [#allocation5], %s3566_s12 }
  0x85   : > { %s406_s17 = scalar_lea.sflag [#allocation6], %s405_s15 }
  0x86   : > { %3263 = dma.done.wait (%p3407_p4), %s406_s17, 256  }
  0x87   : > { %3265 = vsyncadd (%p3407_p4), %s406_s17, 4294967040  ;;  %s418_s3 = scalar_lea.vmem [#allocation7], %s3566_s12  ;;  %p3937_p1 = scmp.eq.s32.totalorder %s3398_s11, 0 }
  0x89   : > { %3267 = dma.done.wait (%p3937_p1), [#allocation9], 2048   ;;  %p3938_p8 = pmov %p3937_p1 }
  0x8a   : > { %p3939_p12 = pmov %p3937_p1 }
  0x8b   : > { %3269 = vsyncadd (%p3938_p8), [#allocation9], 4294965248 }
  0x8c   : > { %3271 = dma.done.wait (%p3939_p12), [#allocation12], 2048   ;;  %p3940_p5 = pmov %p3937_p1 }
  0x8d   : > { %v3311_v0 = vmov 0.0   ;;  %vm3312_vm0 = vmmov 0   ;;  %v2953_v1 = vld [vmem:[#allocation10 + $0x38] sm:$0xff]   ;;  %v2955_v3 = vld [vmem:[#allocation10 + $0x30] sm:$0xff]   ;;  %v2957_v5 = vld [vmem:[#allocation10 + $0x28] sm:$0xff]   ;;  %s3313_s11 = smov 32   ;;  %v855_v47 = vlaneseq }
  0x8e   : > { %3273 = vsyncadd (%p3940_p5), [#allocation12], 4294965248  ;;  %2708 = vmatprep.subr.bf16.mxu1 %v3311_v0  ;;  %2688 = vmatprep.subr.bf16.mxu0 %v3311_v0  ;;  %v2954_v2 = vld [vmem:[#allocation8 + $0x38] sm:$0xff]   ;;  %v2956_v4 = vld [vmem:[#allocation8 + $0x30] sm:$0xff]   ;;  %s3314_s13 = smov 96   ;;  %s3315_s5 = smov 64  }
  0x8f   : > { %2724 = vmatprep.mubr.msk.bf16.mxu1 %vm3312_vm0, %v3311_v0  ;;  %2704 = vmatprep.mubr.msk.bf16.mxu0 %vm3312_vm0, %v3311_v0  ;;  %v2958_v6 = vld [vmem:[#allocation8 + $0x28] sm:$0xff]   ;;  %v2959_v7 = vld [vmem:[#allocation10 + $0x20] sm:$0xff]   ;;  %v2961_v9 = vld [vmem:[#allocation10 + $0x18] sm:$0xff]   ;;  %v3316_v45 = vmov 1983009808   ;;  %v856_v49 = vshrl.u32 %v855_v47, 7 }
  0x90   : > { %2709 = vmatpush3.bf16.msra.mxu1 %v2953_v1  ;;  %2689 = vmatpush3.bf16.msra.mxu0 %v2954_v2  ;;  %v2960_v8 = vld [vmem:[#allocation8 + $0x20] sm:$0xff]   ;;  %v2962_v10 = vld [vmem:[#allocation8 + $0x18] sm:$0xff]   ;;  %v2963_v11 = vld [vmem:[#allocation10 + $0x10] sm:$0xff]   ;;  %v853_v46 = vunpack.c.l.s4 %v3316_v45  ;;  %v3317_v50 = vmov 1934713408   ;;  %v3318_v53 = vmov 0  }
  0x91   : > { %2710 = vmatprep.subr.bf16.mxu1 %v3311_v0  ;;  %2690 = vmatprep.subr.bf16.mxu0 %v3311_v0  ;;  %v2964_v12 = vld [vmem:[#allocation8 + $0x10] sm:$0xff]   ;;  %v2965_v13 = vld [vmem:[#allocation10 + $0x8] sm:$0xff]   ;;  %v2967_v15 = vld [vmem:[#allocation10] sm:$0xff]   ;;  %v884_v51 = vunpack.c.l.s4 %v3317_v50  ;;  %v3637_v54 = vpack.i.b16 %v3318_v53, %v3318_v53  ;;  %vm1635_vm1 = vcmask 261120   ;;  %vm1824_vm2 = vcmask 130048   ;;  %s2563_s1 = sshll.u32 %s3563_s22, 4 }
  0x92   : > { %v2966_v14 = vld [vmem:[#allocation8 + $0x8] sm:$0xff]   ;;  %v2968_v16 = vld [vmem:[#allocation8] sm:$0xff]   ;;  %v2970_v18 = vld [vmem:[%s400_s19] sm:$0xff]   ;;  %v854_v48 = vunpack.c.0.s8 %v853_v46  ;;  %s476_s4 = scalar_lea.vmem [#allocation14], %s2563_s1  ;;  %s2632_s23 = sshll.u32 %s3292_s30, 8 }
  0x93   : > { %v2969_v17 = vld [vmem:[%s409_s26] sm:$0xff]   ;;  %v2971_v19 = vld [vmem:[#allocation11 + $0x38] sm:$0xff]   ;;  %v2972_v20 = vld [vmem:[#allocation11 + $0x30] sm:$0xff]   ;;  %v885_v61 = vunpack.c.0.s8 %v884_v51  ;;  %s2370_s24 = sshll.u32 %s476_s4, 4  ;;  %s3839_s14 = scalar_lea.hbm %s3895_s8, %s2632_s23  ;;  %s3834_s24 = int_to_ptr.vmem [resolvable:$true] %s2370_s24 }
  0x94   : > { %2711 = vmatpush3.bf16.msra.mxu1 %v2955_v3  ;;  %2691 = vmatpush3.bf16.msra.mxu0 %v2956_v4  ;;  %v2973_v21 = vld [vmem:[#allocation11 + $0x28] sm:$0xff]   ;;  %v2974_v22 = vld [vmem:[#allocation11 + $0x20] sm:$0xff]   ;;  %v2975_v23 = vld [vmem:[#allocation11 + $0x18] sm:$0xff]   ;;  %v3639_v59 = vsub.s32 %v854_v48, %v856_v49  ;;  %s2355_s27 = scalar_lea.sflag [#allocation4], %s3563_s22  ;;  %s3208_s20 = scalar_lea.vmem %s3834_s24, 256 }
  0x95   : > { %2712 = vmatprep.subr.bf16.mxu1 %v3311_v0  ;;  %2692 = vmatprep.subr.bf16.mxu0 %v3311_v0  ;;  %v2976_v24 = vld [vmem:[#allocation11 + $0x10] sm:$0xff]   ;;  %v2977_v25 = vld [vmem:[#allocation11 + $0x8] sm:$0xff]   ;;  %v2978_v26 = vld [vmem:[#allocation11] sm:$0xff]   ;;  %p3209_p4 = scmp.ne.s32.totalorder %s3834_s24, %s3208_s20  ;;  %s3319_s30 = smov [#allocation14]  }
  0x96   : > { %v2979_v27 = vld [vmem:[%s418_s3] sm:$0xff]   ;;  %s3212_s12 = sshll.u32 %s3319_s30, 4  ;;  %s3213_s12 = int_to_ptr.vmem [resolvable:$false] %s3212_s12 }
  0x97   : > { %p3210_p2 = pnand %p3209_p4, %p3464_p7  ;;  %s3214_s9 = scalar_lea.vmem %s3213_s12, 512 }
  0x98   : > { %2713 = vmatpush3.bf16.msra.mxu1 %v2957_v5  ;;  %2693 = vmatpush3.bf16.msra.mxu0 %v2958_v6  ;;  %p3215_p6 = scmp.lt.s32.totalorder %s3834_s24, %s3213_s12  ;;  %p3216_p9 = scmp.lt.s32.totalorder %s3214_s9, %s3208_s20 }
  0x99   : > { %2714 = vmatprep.subr.bf16.mxu1 %v3311_v0  ;;  %2694 = vmatprep.subr.bf16.mxu0 %v3311_v0  ;;  %p3211_p3 = pneg %p3210_p2 }
  0x9a   : > { %p3217_p13 = por %p3216_p9, %p3215_p6 }
  0x9c   : > { %2715 = vmatpush3.bf16.msra.mxu1 %v2959_v7  ;;  %2695 = vmatpush3.bf16.msra.mxu0 %v2960_v8  ;;  %v3644_v7 = vsub.s32 %v885_v61, %v856_v49  ;;  %p3218_p0 = pnand %p3217_p13, %p3211_p3 }
  0x9d   : > { %2716 = vmatprep.subr.bf16.mxu1 %v3311_v0  ;;  %2696 = vmatprep.subr.bf16.mxu0 %v3311_v0 }
  0xa0   : > { %2717 = vmatpush3.bf16.msra.mxu1 %v2961_v9  ;;  %2697 = vmatpush3.bf16.msra.mxu0 %v2962_v10 }
  0xa1   : > { %2718 = vmatprep.subr.bf16.mxu1 %v3311_v0  ;;  %2698 = vmatprep.subr.bf16.mxu0 %v3311_v0 }
  0xa4   : > { %2719 = vmatpush3.bf16.msra.mxu1 %v2963_v11  ;;  %2699 = vmatpush3.bf16.msra.mxu0 %v2964_v12 }
  0xa5   : > { %2720 = vmatprep.subr.bf16.mxu1 %v3311_v0  ;;  %2700 = vmatprep.subr.bf16.mxu0 %v3311_v0 }
  0xa8   : > { %2721 = vmatpush3.bf16.msra.mxu1 %v2965_v13  ;;  %2701 = vmatpush3.bf16.msra.mxu0 %v2966_v14 }
  0xa9   : > { %2722 = vmatprep.subr.bf16.mxu1 %v3311_v0  ;;  %2702 = vmatprep.subr.bf16.mxu0 %v3311_v0 }
  0xac   : > { %2723 = vmatpush3.bf16.msra.mxu1 %v2967_v15  ;;  %2703 = vmatpush3.bf16.msra.mxu0 %v2968_v16 }
  0xad   : > { %2748 = vmatprep.subr.bf16.mxu1 %v3311_v0  ;;  %2728 = vmatprep.subr.bf16.mxu0 %v3311_v0 }
  0xaf   : > { %2725 = vmatmul.mubr.bf16.vlgmr.msra.gmra.mxu1 %v2969_v17  ;;  %2705 = vmatmul.mubr.bf16.vlgmr.msra.gmra.mxu0 %v2970_v18 }
  0xb0   : > { %2750 = vmatprep.mubr.msk.bf16.mxu1 %vm3312_vm0, %v3311_v0  ;;  %2729 = vmatpush3.bf16.msra.mxu0 %v2971_v19 }
  0xb1   : > { %2744 = vmatprep.mubr.msk.bf16.mxu0 %vm3312_vm0, %v3311_v0  ;;  %2730 = vmatprep.subr.bf16.mxu0 %v3311_v0 }
  0xb4   : > { %2731 = vmatpush3.bf16.msra.mxu0 %v2972_v20 }
  0xb5   : > { %2732 = vmatprep.subr.bf16.mxu0 %v3311_v0 }
  0xb8   : > { %2733 = vmatpush3.bf16.msra.mxu0 %v2973_v21 }
  0xb9   : > { %2734 = vmatprep.subr.bf16.mxu0 %v3311_v0 }
  0xbc   : > { %2735 = vmatpush3.bf16.msra.mxu0 %v2974_v22 }
  0xbd   : > { %2736 = vmatprep.subr.bf16.mxu0 %v3311_v0 }
  0xc0   : > { %2737 = vmatpush3.bf16.msra.mxu0 %v2975_v23 }
  0xc1   : > { %2738 = vmatprep.subr.bf16.mxu0 %v3311_v0 }
  0xc4   : > { %2739 = vmatpush3.bf16.msra.mxu0 %v2976_v24 }
  0xc5   : > { %2740 = vmatprep.subr.bf16.mxu0 %v3311_v0 }
  0xc8   : > { %2741 = vmatpush3.bf16.msra.mxu0 %v2977_v25 }
  0xc9   : > { %2742 = vmatprep.subr.bf16.mxu0 %v3311_v0 }
  0xcc   : > { %2743 = vmatpush3.bf16.msra.mxu0 %v2978_v26 }
  0xcd   : > { %2772 = vmatprep.subr.bf16.mxu0 %v3311_v0 }
  0xcf   : > { %2745 = vmatmul.mubr.bf16.vlgmr.msra.gmra.mxu0 %v2979_v27 }
  0xd0   : > { %2774 = vmatprep.mubr.msk.bf16.mxu0 %vm3312_vm0, %v3311_v0 }
 0x16f   : > { %v703_v28 = vpop.f32.mrf.mxu1  ;;  %v590_v29 = vpop.f32.mrf.mxu0 }
 0x170   : > { %v597_v32 = vmul.f32 0.17677669, %v590_v29 }
 0x171   : > { %v2726_v30 = vpop.f32.mrf.mxu1  ;;  %v2706_v31 = vpop.f32.mrf.mxu0 }
 0x173   : > { %v706_v33 = vpop.f32.mrf.mxu1  ;;  %v593_v35 = vpop.f32.mrf.mxu0 }
 0x174   : > { %v1095_v34 = vpack.c.bf16 %v706_v33, %v703_v28  ;;  %v598_v36 = vmul.f32 0.17677669, %v593_v35 }
 0x175   : > { %v2727_v37 = vpop.f32.mrf.mxu1  ;;  %v2707_v38 = vpop.f32.mrf.mxu0 }
 0x176   : > { %1101 = vrot.lane.b32.xlu1 %v1095_v34, %s3313_s11  ;;  %1097 = vrot.lane.b32.xlu0 %v1095_v34, %s3314_s13  ;;  %v821_v39 = vpack.c.bf16 %v598_v36, %v597_v32  ;;  %v1107_v57 = vshrl.u32 %v1095_v34, 16 }
 0x178   : > { %v833_v12 = vshrl.u32 %v821_v39, 16 }
 0x17a   : > { %1099 = vrot.lane.b32.xlu0 %v1095_v34, %s3315_s5  ;;  %823 = vrot.lane.b32.xlu1 %v821_v39, %s3314_s13 }
 0x17e   : > { %825 = vrot.lane.b32.xlu0 %v821_v39, %s3315_s5  ;;  %827 = vrot.lane.b32.xlu1 %v821_v39, %s3313_s11 }
 0x18f   : > { %v814_v40 = vpop.f32.mrf.mxu0 }
 0x191   : > { %v2746_v41 = vpop.f32.mrf.mxu0 }
 0x193   : > { %v817_v42 = vpop.f32.mrf.mxu0 }
 0x194   : > { %v3633_v43 = vpack.c.bf16 %v817_v42, %v814_v40 }
 0x195   : > { %v2747_v44 = vpop.f32.mrf.mxu0 }
 0x196   : > { %1365 = vrot.lane.b32.xlu1 %v3633_v43, %s3314_s13  ;;  %1367 = vrot.lane.b32.xlu0 %v3633_v43, %s3315_s5 }
 0x1e8   : > { %v1102_v52 = vpop.permute.xlu1 %1101  ;;  %v1098_v55 = vpop.permute.xlu0 %1097 }
 0x1e9   : > { %v1105_v56 = vpack.i.b16 %v1098_v55, %v1095_v34  ;;  %v1108_v58 = vshrl.u32 %v1098_v55, 16  ;;  %v1116_v3 = vshrl.u32 %v1102_v52, 16 }
 0x1eb   : > { %v1109_v60 = vpack.i.b16 %v1108_v58, %v1107_v57  ;;  %v1119_v62 = vcombine.high %v1105_v56, %v3637_v54  ;;  %v1126_v6 = vrot.slane %v1105_v56, %v3639_v59 }
 0x1ec   : > { %v1100_v63 = vpop.permute.xlu0 %1099  ;;  %v824_v2 = vpop.permute.xlu1 %823 }
 0x1ed   : > { %v1113_v1 = vpack.i.b16 %v1102_v52, %v1100_v63  ;;  %v1185_v4 = vcombine.high %v1109_v60, %v3637_v54  ;;  %v1115_v5 = vshrl.u32 %v1100_v63, 16  ;;  %v1133_v10 = vrot.slane %v1119_v62, %v3639_v59 }
 0x1ee   : > { %v834_v13 = vshrl.u32 %v824_v2, 16  ;;  %v1192_v14 = vrot.slane %v1109_v60, %v3639_v59  ;;  %v831_v21 = vpack.i.b16 %v824_v2, %v821_v39 }
 0x1ef   : > { %v1134_v8 = vcombine.high %v1113_v1, %v3637_v54  ;;  %v1141_v9 = vrot.slane %v1113_v1, %v3639_v59  ;;  %v1117_v11 = vpack.i.b16 %v1116_v3, %v1115_v5  ;;  %v1199_v18 = vrot.slane %v1185_v4, %v3639_v59 }
 0x1f0   : > { %v835_v29 = vpack.i.b16 %v834_v13, %v833_v12  ;;  %v826_v30 = vpop.permute.xlu0 %825  ;;  %v828_v39 = vpop.permute.xlu1 %827  ;;  %v851_v44 = vcombine.high %v831_v21, %v3637_v54  ;;  %v858_v45 = vrot.slane %v831_v21, %v3639_v59 }
 0x1f1   : > { %v1148_v15 = vrot.slane %v1134_v8, %v3639_v59  ;;  %v1149_v16 = vcombine.low %v1126_v6, %v1141_v9  ;;  %v1150_v17 = vcombine.high %v1126_v6, %v1141_v9  ;;  %v1200_v19 = vcombine.high %v1117_v11, %v3637_v54 }
 0x1f2   : > { %v1207_v20 = vrot.slane %v1117_v11, %v3639_v59  ;;  %v841_v42 = vshrl.u32 %v826_v30, 16  ;;  %v917_v46 = vcombine.high %v835_v29, %v3637_v54  ;;  %v839_v49 = vpack.i.b16 %v828_v39, %v826_v30 }
 0x1f3   : > { %v1157_v22 = vrot.slane %v1149_v16, %v3644_v7  ;;  %v1164_v23 = vrot.slane %v1150_v17, %v3644_v7  ;;  %v1165_v24 = vcombine.low %v1133_v10, %v1148_v15  ;;  %v1166_v25 = vcombine.high %v1133_v10, %v1148_v15 }
 0x1f4   : > { %v1214_v26 = vrot.slane %v1200_v19, %v3639_v59  ;;  %v1215_v27 = vcombine.low %v1192_v14, %v1207_v20  ;;  %v1216_v28 = vcombine.high %v1192_v14, %v1207_v20  ;;  %v842_v50 = vshrl.u32 %v828_v39, 16 }
 0x1f5   : > { %v1173_v31 = vrot.slane %v1165_v24, %v3644_v7  ;;  %v1180_v32 = vrot.slane %v1166_v25, %v3644_v7  ;;  %v1251_v33 = vcombine.low %v1157_v22, %v1164_v23  ;;  %v2595_v34 = vcombine.high %v1157_v22, %v1164_v23 }
 0x1f6   : > { %v1223_v35 = vrot.slane %v1215_v27, %v3644_v7  ;;  %v1230_v36 = vrot.slane %v1216_v28, %v3644_v7  ;;  %v1231_v37 = vcombine.low %v1199_v18, %v1214_v26  ;;  %v1232_v38 = vcombine.high %v1199_v18, %v1214_v26 }
 0x1f7   : > { %v1267_v40 = vcombine.low %v1173_v31, %v1180_v32  ;;  %v2596_v41 = vcombine.high %v1173_v31, %v1180_v32  ;;  %v1258_v47 = vrot.slane %v1251_v33, %v3639_v59  ;;  %v1266_v48 = vrot.slane %v2595_v34, %v3639_v59 }
 0x1f8   : > { %v1239_v51 = vrot.slane %v1231_v37, %v3644_v7  ;;  %v1246_v52 = vrot.slane %v1232_v38, %v3644_v7  ;;  %v1301_v53 = vcombine.low %v1223_v35, %v1230_v36  ;;  %v843_v56 = vpack.i.b16 %v842_v50, %v841_v42 }
 0x1f9   : > { %v1274_v55 = vrot.slane %v1267_v40, %v3639_v59  ;;  %v866_v57 = vcombine.high %v839_v49, %v3637_v54  ;;  %v873_v58 = vrot.slane %v839_v49, %v3639_v59  ;;  %v1282_v60 = vrot.slane %v2596_v41, %v3639_v59 }
 0x1fa   : > { %v2597_v61 = vcombine.high %v1223_v35, %v1230_v36  ;;  %v865_v62 = vrot.slane %v851_v44, %v3639_v59  ;;  %v924_v63 = vrot.slane %v835_v29, %v3639_v59  ;;  %v931_v1 = vrot.slane %v917_v46, %v3639_v59 }
 0x1fb   : > { %v880_v2 = vrot.slane %v866_v57, %v3639_v59  ;;  %v881_v3 = vcombine.low %v858_v45, %v873_v58  ;;  %v882_v4 = vcombine.high %v858_v45, %v873_v58  ;;  %v932_v5 = vcombine.high %v843_v56, %v3637_v54 }
 0x1fc   : > { %v1317_v6 = vcombine.low %v1239_v51, %v1246_v52  ;;  %v2598_v8 = vcombine.high %v1239_v51, %v1246_v52  ;;  %v939_v9 = vrot.slane %v843_v56, %v3639_v59  ;;  %v1283_v10 = vcombine.low %v1258_v47, %v1266_v48 }
 0x1fd   : > { %v897_v11 = vcombine.low %v865_v62, %v880_v2  ;;  %v898_v12 = vcombine.high %v865_v62, %v880_v2  ;;  %v1291_v13 = vcombine.low %v1274_v55, %v1282_v60  ;;  %v1308_v14 = vrot.slane %v1301_v53, %v3639_v59 }
 0x1fe   : > { %v946_v15 = vrot.slane %v932_v5, %v3639_v59  ;;  %v947_v16 = vcombine.low %v924_v63, %v939_v9  ;;  %v948_v17 = vcombine.high %v924_v63, %v939_v9  ;;  %v1316_v18 = vrot.slane %v2597_v61, %v3639_v59 }
 0x1ff   : > { %v889_v19 = vrot.slane %v881_v3, %v3644_v7  ;;  %v896_v20 = vrot.slane %v882_v4, %v3644_v7  ;;  %v905_v21 = vrot.slane %v897_v11, %v3644_v7  ;;  %v912_v22 = vrot.slane %v898_v12, %v3644_v7 }
 0x200   : > { %v955_v23 = vrot.slane %v947_v16, %v3644_v7  ;;  %v962_v24 = vrot.slane %v948_v17, %v3644_v7  ;;  %v963_v25 = vcombine.low %v931_v1, %v946_v15  ;;  %v964_v26 = vcombine.high %v931_v1, %v946_v15 }
 0x201   : > { %v999_v27 = vcombine.low %v905_v21, %v912_v22  ;;  %v2592_v28 = vcombine.high %v905_v21, %v912_v22  ;;  %v1324_v29 = vrot.slane %v1317_v6, %v3639_v59  ;;  %v1332_v30 = vrot.slane %v2598_v8, %v3639_v59 }
 0x202   : > { %v971_v31 = vrot.slane %v963_v25, %v3644_v7  ;;  %v978_v32 = vrot.slane %v964_v26, %v3644_v7  ;;  %v1033_v33 = vcombine.low %v955_v23, %v962_v24  ;;  %v2593_v34 = vcombine.high %v955_v23, %v962_v24 }
 0x203   : > { %v983_v35 = vcombine.low %v889_v19, %v896_v20  ;;  %v2591_v36 = vcombine.high %v889_v19, %v896_v20  ;;  %v1333_v37 = vcombine.low %v1308_v14, %v1316_v18  ;;  %v1006_v38 = vrot.slane %v999_v27, %v3639_v59 }
 0x204   : > { %v1049_v39 = vcombine.low %v971_v31, %v978_v32  ;;  %v2594_v40 = vcombine.high %v971_v31, %v978_v32  ;;  %v1298_v41 = vrot.slane %v1291_v13, %v3644_v7  ;;  %v1014_v42 = vrot.slane %v2592_v28, %v3639_v59 }
 0x205   : > { %v1040_v44 = vrot.slane %v1033_v33, %v3639_v59  ;;  %v1048_v45 = vrot.slane %v2593_v34, %v3639_v59  ;;  %v1341_v46 = vcombine.low %v1324_v29, %v1332_v30  ;;  %v1290_v49 = vrot.slane %v1283_v10, %v3644_v7 }
 0x206   : > { %v1056_v47 = vrot.slane %v1049_v39, %v3639_v59  ;;  %v1064_v48 = vrot.slane %v2594_v40, %v3639_v59  ;;  %v990_v50 = vrot.slane %v983_v35, %v3639_v59  ;;  %v998_v51 = vrot.slane %v2591_v36, %v3639_v59 }
 0x207   : > { %v1340_v52 = vrot.slane %v1333_v37, %v3644_v7  ;;  %v1348_v53 = vrot.slane %v1341_v46, %v3644_v7  ;;  %v1023_v56 = vcombine.low %v1006_v38, %v1014_v42  ;;  %v1065_v57 = vcombine.low %v1040_v44, %v1048_v45 }
 0x208   : > { %v1073_v55 = vcombine.low %v1056_v47, %v1064_v48  ;;  %v1299_v58 = vcombine.low %v1290_v49, %v1298_v41  ;;  %v1015_v61 = vcombine.low %v990_v50, %v998_v51  ;;  %v1300_v15 = vcombine.high %v1290_v49, %v1298_v41 }
 0x209   : > { %v1349_v60 = vcombine.low %v1340_v52, %v1348_v53  ;;  %v1030_v2 = vrot.slane %v1023_v56, %v3644_v7  ;;  %v1072_v3 = vrot.slane %v1065_v57, %v3644_v7  ;;  %v1350_v13 = vcombine.high %v1340_v52, %v1348_v53  ;;  %v1368_v56 = vpop.permute.xlu0 %1367  ;;  %v1366_v57 = vpop.permute.xlu1 %1365 }
 0x20a   : > { %v1080_v63 = vrot.slane %v1073_v55, %v3644_v7  ;;  %v1022_v5 = vrot.slane %v1015_v61, %v3644_v7  ;;  %v1354_v8 = vshrl.u32 %v1299_v58, 16  ;;  %v1360_v22 = vshrl.u32 %v1300_v15, 16 }
 0x20b   : > { %v1353_v62 = vpack.i.b16 %v1349_v60, %v1299_v58  ;;  %v1355_v4 = vshrl.u32 %v1349_v60, 16  ;;  %v1359_v17 = vpack.i.b16 %v1350_v13, %v1300_v15  ;;  %v1361_v20 = vshrl.u32 %v1350_v13, 16 }
 0x20c   : > { %v1081_v6 = vcombine.low %v1072_v3, %v1080_v63  ;;  %v1031_v9 = vcombine.low %v1022_v5, %v1030_v2  ;;  %v1082_v21 = vcombine.high %v1072_v3, %v1080_v63  ;;  %v1032_v23 = vcombine.high %v1022_v5, %v1030_v2 }
 0x20d   : > { %v1640_v1 = vsel %vm1635_vm1, %v1353_v62, 0  ;;  %v1356_v10 = vpack.i.b16 %v1355_v4, %v1354_v8  ;;  %v1734_v19 = vsel %vm1635_vm1, %v1359_v17, 0  ;;  %v1362_v24 = vpack.i.b16 %v1361_v20, %v1360_v22 }
 0x20e   : > { %2749 = vmatpush3.bf16.xpose.msra.mxu1 %v1640_v1  ;;  %v1085_v11 = vpack.i.b16 %v1081_v6, %v1031_v9  ;;  %v1087_v14 = vshrl.u32 %v1081_v6, 16  ;;  %v1086_v16 = vshrl.u32 %v1031_v9, 16  ;;  %v1091_v25 = vpack.i.b16 %v1082_v21, %v1032_v23 }
 0x20f   : > { %2754 = vmatprep.subr.bf16.mxu1 %v3311_v0  ;;  %v1687_v12 = vsel %vm1635_vm1, %v1356_v10, 0  ;;  %v1781_v26 = vsel %vm1635_vm1, %v1362_v24, 0  ;;  %v1093_v27 = vshrl.u32 %v1082_v21, 16  ;;  %v1092_v28 = vshrl.u32 %v1032_v23, 16 }
 0x210   : > { %v1088_v18 = vpack.i.b16 %v1087_v14, %v1086_v16  ;;  %v1375_v61 = vshrl.u32 %v3633_v43, 16  ;;  %v1376_v62 = vshrl.u32 %v1366_v57, 16  ;;  %v1373_v1 = vpack.i.b16 %v1366_v57, %v3633_v43 }
 0x211   : > { %v1094_v29 = vpack.i.b16 %v1093_v27, %v1092_v28  ;;  %v1383_v8 = vshrl.u32 %v1368_v56, 16 }
 0x212   : > { %v1377_v4 = vpack.i.b16 %v1376_v62, %v1375_v61  ;;  %v1387_v6 = vcombine.high %v1373_v1, %v3637_v54  ;;  %v1394_v14 = vrot.slane %v1373_v1, %v3639_v59 }
 0x214   : > { %v1453_v15 = vcombine.high %v1377_v4, %v3637_v54  ;;  %v1460_v20 = vrot.slane %v1377_v4, %v3639_v59 }
 0x215   : > { %2751 = vmatmul.mubr.msk.bf16.vlgmr.msra.gmra.mxu1 %vm1635_vm1, %v1085_v11 }
 0x216   : > { %2755 = vmatpush3.bf16.xpose.msra.mxu1 %v1687_v12  ;;  %2756 = vmatprep.mubr.msk.bf16.mxu1 %vm3312_vm0, %v3311_v0 }
 0x217   : > { %2760 = vmatprep.subr.bf16.mxu1 %v3311_v0 }
 0x21d   : > { %2757 = vmatmul.mubr.msk.bf16.vlgmr.msra.gmra.mxu1 %vm1635_vm1, %v1088_v18 }
 0x21e   : > { %2761 = vmatpush3.bf16.xpose.msra.mxu1 %v1734_v19  ;;  %2762 = vmatprep.mubr.msk.bf16.mxu1 %vm3312_vm0, %v3311_v0  ;;  %v1401_v19 = vrot.slane %v1387_v6, %v3639_v59 }
 0x21f   : > { %2766 = vmatprep.subr.bf16.mxu1 %v3311_v0 }
 0x225   : > { %2763 = vmatmul.mubr.msk.bf16.vlgmr.msra.gmra.mxu1 %vm1635_vm1, %v1091_v25  ;;  %v1467_v25 = vrot.slane %v1453_v15, %v3639_v59 }
 0x226   : > { %2767 = vmatpush3.bf16.xpose.msra.mxu1 %v1781_v26  ;;  %2768 = vmatprep.mubr.msk.bf16.mxu1 %vm3312_vm0, %v3311_v0 }
 0x227   : > { %2778 = vmatprep.subr.bf16.mxu1 %v3311_v0 }
 0x22d   : > { %2769 = vmatmul.mubr.msk.bf16.vlgmr.msra.gmra.mxu1 %vm1635_vm1, %v1094_v29 }
 0x22e   : > { %2780 = vmatprep.mubr.msk.bf16.mxu1 %vm3312_vm0, %v3311_v0 }
 0x2d5   : > { %v1676_v30 = vpop.f32.mrf.mxu1 }
 0x2d6   : > { %v1825_v31 = vsel %vm1824_vm2, %v1676_v30, -inf }
 0x2d7   : > { %v2752_v32 = vpop.f32.mrf.mxu1  ;;  %1826 = vmax.xlane.f32.xlu0 %v1825_v31 }
 0x2d9   : > { %v1679_v33 = vpop.f32.mrf.mxu1 }
 0x2da   : > { %v1828_v34 = vsel %vm1824_vm2, %v1679_v33, -inf }
 0x2db   : > { %v2753_v35 = vpop.f32.mrf.mxu1  ;;  %1829 = vmax.xlane.f32.xlu1 %v1828_v34 }
 0x2dd   : > { %v1723_v36 = vpop.f32.mrf.mxu1 }
 0x2de   : > { %v1831_v37 = vsel %vm1824_vm2, %v1723_v36, -inf }
 0x2df   : > { %v2758_v38 = vpop.f32.mrf.mxu1  ;;  %1832 = vmax.xlane.f32.xlu0 %v1831_v37 }
 0x2e1   : > { %v3730_v39 = vpop.f32.mrf.mxu1 }
 0x2e2   : > { %v1834_v40 = vsel %vm1824_vm2, %v3730_v39, -inf }
 0x2e3   : > { %v2759_v41 = vpop.f32.mrf.mxu1  ;;  %1835 = vmax.xlane.f32.xlu0 %v1834_v40 }
 0x2e5   : > { %v3734_v42 = vpop.f32.mrf.mxu1 }
 0x2e6   : > { %v1837_v53 = vsel %vm1824_vm2, %v3734_v42, -inf }
 0x2e7   : > { %v2764_v44 = vpop.f32.mrf.mxu1 }
 0x2e9   : > { %v3736_v45 = vpop.f32.mrf.mxu1 }
 0x2ea   : > { %v1840_v46 = vsel %vm1824_vm2, %v3736_v45, -inf }
 0x2eb   : > { %v2765_v47 = vpop.f32.mrf.mxu1  ;;  %1841 = vmax.xlane.f32.xlu0 %v1840_v46 }
 0x2ec   : > { %1369 = vrot.lane.b32.xlu1 %v3633_v43, %s3313_s11 }
 0x2ed   : > { %v3742_v48 = vpop.f32.mrf.mxu1 }
 0x2ee   : > { %v1843_v49 = vsel %vm1824_vm2, %v3742_v48, -inf }
 0x2ef   : > { %v2770_v50 = vpop.f32.mrf.mxu1  ;;  %1844 = vmax.xlane.f32.xlu0 %v1843_v49 }
 0x2f1   : > { %v3746_v51 = vpop.f32.mrf.mxu1 }
 0x2f2   : > { %v1846_v55 = vsel %vm1824_vm2, %v3746_v51, -inf }
 0x2f3   : > { %v2771_v52 = vpop.f32.mrf.mxu1 }
 0x310   : > { %1838 = vmax.xlane.f32.xlu1 %v1837_v53 }
 0x314   : > { %1847 = vmax.xlane.f32.xlu1 %v1846_v55 }
 0x360   : > { %v1827_v58 = vpop.xlane.xlu0 %1826 }
 0x361   : > { %v1849_v60 = vsub.f32 %v1676_v30, %v1827_v58 }
 0x363   : > { %v1857_v63 = vmul.f32 1.442695, %v1849_v60 }
 0x364   : > { %v1830_v2 = vpop.xlane.xlu1 %1829 }
 0x365   : > { %2988 = vpow2.f32 %v1857_v63  ;;  %v1850_v3 = vsub.f32 %v1679_v33, %v1830_v2 }
 0x367   : > { %v1859_v5 = vmul.f32 1.442695, %v1850_v3 }
 0x368   : > { %v1833_v9 = vpop.xlane.xlu0 %1832  ;;  %v1370_v10 = vpop.permute.xlu1 %1369 }
 0x369   : > { %2990 = vpow2.f32 %v1859_v5  ;;  %v1851_v11 = vsub.f32 %v1723_v36, %v1833_v9  ;;  %v1381_v12 = vpack.i.b16 %v1370_v10, %v1368_v56  ;;  %v1384_v13 = vshrl.u32 %v1370_v10, 16 }
 0x36b   : > { %v1861_v16 = vmul.f32 1.442695, %v1851_v11  ;;  %v1385_v43 = vpack.i.b16 %v1384_v13, %v1383_v8  ;;  %v1402_v17 = vcombine.high %v1381_v12, %v3637_v54  ;;  %v1409_v18 = vrot.slane %v1381_v12, %v3639_v59 }
 0x36c   : > { %v1836_v21 = vpop.xlane.xlu0 %1835 }
 0x36d   : > { %2992 = vpow2.f32 %v1861_v16  ;;  %v1416_v22 = vrot.slane %v1402_v17, %v3639_v59  ;;  %v1417_v23 = vcombine.low %v1394_v14, %v1409_v18  ;;  %v1418_v24 = vcombine.high %v1394_v14, %v1409_v18 }
 0x36e   : > { %v1468_v26 = vcombine.high %v1385_v43, %v3637_v54  ;;  %v1475_v27 = vrot.slane %v1385_v43, %v3639_v59  ;;  %v1852_v28 = vsub.f32 %v3730_v39, %v1836_v21 }
 0x36f   : > { %v1425_v29 = vrot.slane %v1417_v23, %v3644_v7  ;;  %v1432_v30 = vrot.slane %v1418_v24, %v3644_v7  ;;  %v1433_v31 = vcombine.low %v1401_v19, %v1416_v22  ;;  %v1434_v32 = vcombine.high %v1401_v19, %v1416_v22 }
 0x370   : > { %v1482_v33 = vrot.slane %v1468_v26, %v3639_v59  ;;  %v1483_v34 = vcombine.low %v1460_v20, %v1475_v27  ;;  %v1484_v35 = vcombine.high %v1460_v20, %v1475_v27  ;;  %v1863_v36 = vmul.f32 1.442695, %v1852_v28 }
 0x371   : > { %v1441_v37 = vrot.slane %v1433_v31, %v3644_v7  ;;  %v1448_v38 = vrot.slane %v1434_v32, %v3644_v7  ;;  %v1519_v54 = vcombine.low %v1425_v29, %v1432_v30  ;;  %v2599_v40 = vcombine.high %v1425_v29, %v1432_v30 }
 0x372   : > { %v2989_v41 = vpop.eup %2988  ;;  %v1491_v39 = vrot.slane %v1483_v34, %v3644_v7  ;;  %v1498_v44 = vrot.slane %v1484_v35, %v3644_v7  ;;  %v1499_v46 = vcombine.low %v1467_v25, %v1482_v33  ;;  %v1500_v47 = vcombine.high %v1467_v25, %v1482_v33 }
 0x373   : > { %v1526_v49 = vrot.slane %v1519_v54, %v3639_v59  ;;  %v1534_v50 = vrot.slane %v2599_v40, %v3639_v59  ;;  %v1535_v52 = vcombine.low %v1441_v37, %v1448_v38  ;;  %v2600_v53 = vcombine.high %v1441_v37, %v1448_v38 }
 0x374   : > { %v1507_v55 = vrot.slane %v1499_v46, %v3644_v7  ;;  %v1514_v56 = vrot.slane %v1500_v47, %v3644_v7  ;;  %v1569_v57 = vcombine.low %v1491_v39, %v1498_v44  ;;  %v2601_v58 = vcombine.high %v1491_v39, %v1498_v44  ;;  %v1842_v60 = vpop.xlane.xlu0 %1841 }
 0x375   : > { %v1542_v61 = vrot.slane %v1535_v52, %v3639_v59  ;;  %v1550_v62 = vrot.slane %v2600_v53, %v3639_v59  ;;  %2994 = vpow2.f32 %v1863_v36  ;;  %v1873_v63 = vsel %vm1824_vm2, %v2989_v41, 0.0 }
 0x376   : > { %v2991_v1 = vpop.eup %2990  ;;  %v1576_v2 = vrot.slane %v1569_v57, %v3639_v59  ;;  %v1584_v3 = vrot.slane %v2601_v58, %v3639_v59  ;;  %v1585_v4 = vcombine.low %v1507_v55, %v1514_v56  ;;  %v2602_v5 = vcombine.high %v1507_v55, %v1514_v56  ;;  %1874 = vadd.xlane.f32.xlu0 %v1873_v63  ;;  %v2980_v55 = vld [vmem:[#allocation13 + $0x8] sm:$0xff]   ;;  %v2981_v56 = vld [vmem:[#allocation13 + $0x18] sm:$0xff]   ;;  %v2982_v57 = vld [vmem:[#allocation13] sm:$0xff]  }
 0x377   : > { %v1854_v6 = vsub.f32 %v3736_v45, %v1842_v60  ;;  %v1876_v8 = vsel %vm1824_vm2, %v2991_v1, 0.0  ;;  %v1551_v9 = vcombine.low %v1526_v49, %v1534_v50  ;;  %v1559_v10 = vcombine.low %v1542_v61, %v1550_v62  ;;  %v2983_v58 = vld [vmem:[#allocation13 + $0x10] sm:$0xff]  }
 0x378   : > { %1877 = vadd.xlane.f32.xlu1 %v1876_v8  ;;  %v1592_v11 = vrot.slane %v1585_v4, %v3639_v59  ;;  %v1600_v12 = vrot.slane %v2602_v5, %v3639_v59  ;;  %v1601_v13 = vcombine.low %v1576_v2, %v1584_v3  ;;  %v1905_v30 = vpack.c.bf16 %v2991_v1, %v2989_v41  ;;  %v1845_v36 = vpop.xlane.xlu0 %1844 }
 0x379   : > { %v1867_v14 = vmul.f32 1.442695, %v1854_v6  ;;  %v1566_v15 = vrot.slane %v1559_v10, %v3644_v7  ;;  %v1558_v43 = vrot.slane %v1551_v9, %v3644_v7  ;;  %v1855_v37 = vsub.f32 %v3742_v48, %v1845_v36 }
 0x37a   : > { %v2993_v16 = vpop.eup %2992  ;;  %v1609_v17 = vcombine.low %v1592_v11, %v1600_v12  ;;  %v1608_v19 = vrot.slane %v1601_v13, %v3644_v7 }
 0x37b   : > { %2996 = vpow2.f32 %v1867_v14  ;;  %v1879_v45 = vsel %vm1824_vm2, %v2993_v16, 0.0  ;;  %v1567_v18 = vcombine.low %v1558_v43, %v1566_v15  ;;  %v1568_v25 = vcombine.high %v1558_v43, %v1566_v15  ;;  %v2984_v15 = vld [vmem:[#allocation13 + $0x28] sm:$0xff]  }
 0x37c   : > { %1880 = vadd.xlane.f32.xlu0 %v1879_v45  ;;  %v1616_v20 = vrot.slane %v1609_v17, %v3644_v7  ;;  %v1869_v40 = vmul.f32 1.442695, %v1855_v37 }
 0x37d   : > { %v1623_v23 = vshrl.u32 %v1567_v18, 16  ;;  %v1631_v32 = vshrl.u32 %v1568_v25, 16 }
 0x37e   : > { %v1617_v21 = vcombine.low %v1608_v19, %v1616_v20  ;;  %v1618_v22 = vcombine.high %v1608_v19, %v1616_v20  ;;  %v2985_v20 = vld [vmem:[#allocation13 + $0x20] sm:$0xff]  }
 0x380   : > { %v1621_v59 = vpack.i.b16 %v1617_v21, %v1567_v18  ;;  %v1624_v24 = vshrl.u32 %v1617_v21, 16  ;;  %v1632_v28 = vshrl.u32 %v1618_v22, 16  ;;  %v1629_v31 = vpack.i.b16 %v1618_v22, %v1568_v25  ;;  %v2986_v18 = vld [vmem:[#allocation13 + $0x38] sm:$0xff]   ;;  %v2987_v21 = vld [vmem:[#allocation13 + $0x30] sm:$0xff]  }
 0x382   : > { %v2995_v26 = vpop.eup %2994  ;;  %2773 = vmatpush3.bf16.msra.mxu0 %v1621_v59  ;;  %v1625_v27 = vpack.i.b16 %v1624_v24, %v1623_v23  ;;  %v1633_v33 = vpack.i.b16 %v1632_v28, %v1631_v32 }
 0x383   : > { %v1882_v29 = vsel %vm1824_vm2, %v2995_v26, 0.0  ;;  %2784 = vmatprep.subr.bf16.mxu0 %v3311_v0  ;;  %v1906_v7 = vpack.c.bf16 %v2995_v26, %v2993_v16 }
 0x384   : > { %1883 = vadd.xlane.f32.xlu1 %v1882_v29  ;;  %2779 = vmatpush3.bf16.msra.mxu1 %v1625_v27 }
 0x385   : > { %2775 = vmatmul.mubr.msk.bf16.vlgmr.msra.gmra.mxu0 %vm1824_vm2, %v1905_v30  ;;  %2790 = vmatprep.subr.bf16.mxu1 %v3311_v0 }
 0x386   : > { %2785 = vmatpush3.bf16.msra.mxu0 %v1629_v31  ;;  %2786 = vmatprep.mubr.msk.bf16.mxu0 %vm3312_vm0, %v3311_v0 }
 0x387   : > { %2781 = vmatmul.mubr.msk.bf16.vlgmr.msra.gmra.mxu1 %vm1824_vm2, %v1906_v7  ;;  %2796 = vmatprep.subr.bf16.mxu0 %v3311_v0 }
 0x388   : > { %v2997_v34 = vpop.eup %2996  ;;  %2791 = vmatpush3.bf16.msra.mxu1 %v1633_v33  ;;  %2792 = vmatprep.mubr.msk.bf16.mxu1 %vm3312_vm0, %v3311_v0 }
 0x389   : > { %v1888_v35 = vsel %vm1824_vm2, %v2997_v34, 0.0  ;;  %2804 = vmatprep.subr.bf16.mxu1 %v3311_v0 }
 0x38a   : > { %1889 = vadd.xlane.f32.xlu1 %v1888_v35 }
 0x399   : > { %v1839_v38 = vpop.xlane.xlu1 %1838 }
 0x39a   : > { %v1853_v54 = vsub.f32 %v3734_v42, %v1839_v38 }
 0x39c   : > { %v1865_v41 = vmul.f32 1.442695, %v1853_v54 }
 0x39d   : > { %v1848_v39 = vpop.xlane.xlu1 %1847 }
 0x39e   : > { %2998 = vpow2.f32 %v1865_v41  ;;  %v1856_v44 = vsub.f32 %v3746_v51, %v1848_v39 }
 0x39f   : > { %3000 = vpow2.f32 %v1869_v40 }
 0x3a0   : > { %v1871_v46 = vmul.f32 1.442695, %v1856_v44 }
 0x3a2   : > { %3002 = vpow2.f32 %v1871_v46 }
 0x3ab   : > { %v2999_v47 = vpop.eup %2998 }
 0x3ac   : > { %v1885_v49 = vsel %vm1824_vm2, %v2999_v47, 0.0  ;;  %v1907_v50 = vpack.c.bf16 %v2997_v34, %v2999_v47  ;;  %v3001_v52 = vpop.eup %3000 }
 0x3ad   : > { %1886 = vadd.xlane.f32.xlu0 %v1885_v49  ;;  %v1891_v42 = vsel %vm1824_vm2, %v3001_v52, 0.0 }
 0x3ae   : > { %2787 = vmatmul.mubr.msk.bf16.vlgmr.msra.gmra.mxu0 %vm1824_vm2, %v1907_v50 }
 0x3af   : > { %v3003_v48 = vpop.eup %3002  ;;  %2800 = vmatprep.mubr.msk.bf16.mxu0 %vm3312_vm0, %v3311_v0  ;;  %2797 = vmatpush3.bf16.msra.mxu0 %v2980_v55 }
 0x3b0   : > { %v1894_v53 = vsel %vm1824_vm2, %v3003_v48, 0.0  ;;  %v1908_v51 = vpack.c.bf16 %v3003_v48, %v3001_v52  ;;  %2798 = vmatprep.subr.bf16.mxu0 %v3311_v0 }
 0x3b1   : > { %1892 = vadd.xlane.f32.xlu0 %v1891_v42  ;;  %1895 = vadd.xlane.f32.xlu1 %v1894_v53 }
 0x3b2   : > { %2793 = vmatmul.mubr.msk.bf16.vlgmr.msra.gmra.mxu1 %vm1824_vm2, %v1908_v51 }
 0x3b3   : > { %2808 = vmatprep.mubr.msk.bf16.mxu1 %vm3312_vm0, %v3311_v0  ;;  %2805 = vmatpush3.bf16.msra.mxu1 %v2981_v56 }
 0x3b4   : > { %2806 = vmatprep.subr.bf16.mxu1 %v3311_v0  ;;  %2799 = vmatpush3.bf16.msra.mxu0 %v2982_v57  ;;  %v2623_v57 = vld [vmem:[%s3894_s7] ss:$0 sm:$0xff] }
 0x3b5   : > { %2812 = vmatprep.subr.bf16.mxu0 %v3311_v0 }
 0x3b7   : > { %2807 = vmatpush3.bf16.msra.mxu1 %v2983_v58 }
 0x3b8   : > { %2820 = vmatprep.subr.bf16.mxu1 %v3311_v0 }
 0x3ff   : > { %v1875_v60 = vpop.xlane.xlu0 %1874 }
 0x400   : > { %3004 = vrcp.f32 %v1875_v60 }
 0x401   : > { %v1878_v61 = vpop.xlane.xlu1 %1877 }
 0x402   : > { %3006 = vrcp.f32 %v1878_v61 }
 0x405   : > { %v1881_v62 = vpop.xlane.xlu0 %1880 }
 0x406   : > { %3008 = vrcp.f32 %v1881_v62 }
 0x40d   : > { %v1884_v63 = vpop.xlane.xlu1 %1883  ;;  %v3005_v4 = vpop.eup %3004 }
 0x40e   : > { %3010 = vrcp.f32 %v1884_v63 }
 0x40f   : > { %v3007_v5 = vpop.eup %3006 }
 0x413   : > { %v3009_v9 = vpop.eup %3008  ;;  %v1890_v59 = vpop.xlane.xlu1 %1889 }
 0x414   : > { %3012 = vrcp.f32 %v1890_v59 }
 0x41b   : > { %v3011_v12 = vpop.eup %3010 }
 0x421   : > { %v3013_v27 = vpop.eup %3012 }
 0x436   : > { %v1887_v22 = vpop.xlane.xlu0 %1886 }
 0x437   : > { %3014 = vrcp.f32 %v1887_v22 }
 0x43a   : > { %v1893_v23 = vpop.xlane.xlu0 %1892  ;;  %v1896_v24 = vpop.xlane.xlu1 %1895 }
 0x43b   : > { %3016 = vrcp.f32 %v1893_v23 }
 0x43c   : > { %3018 = vrcp.f32 %v1896_v24 }
 0x444   : > { %v3015_v28 = vpop.eup %3014 }
 0x445   : > { %v1946_v1 = vpop.f32.mrf.mxu0 }
 0x446   : > { %v2085_v10 = vmul.f32 %v3005_v4, %v1946_v1 }
 0x447   : > { %v2776_v2 = vpop.f32.mrf.mxu0  ;;  %v1990_v3 = vpop.f32.mrf.mxu1 }
 0x448   : > { %v2087_v16 = vmul.f32 %v3009_v9, %v1990_v3  ;;  %v3017_v33 = vpop.eup %3016 }
 0x449   : > { %v1949_v6 = vpop.f32.mrf.mxu0  ;;  %v2782_v8 = vpop.f32.mrf.mxu1 }
 0x44a   : > { %v2086_v11 = vmul.f32 %v3007_v5, %v1949_v6  ;;  %v3019_v35 = vpop.eup %3018 }
 0x44b   : > { %v2777_v13 = vpop.f32.mrf.mxu0  ;;  %v1993_v14 = vpop.f32.mrf.mxu1 }
 0x44c   : > { %v2093_v43 = vpack.c.bf16 %v2086_v11, %v2085_v10  ;;  %v2088_v17 = vmul.f32 %v3011_v12, %v1993_v14 }
 0x44d   : > { %v2783_v45 = vpop.f32.mrf.mxu1 }
 0x44e   : > { %v2094_v19 = vpack.c.bf16 %v2088_v17, %v2087_v16  ;;  %2801 = vmatmul.mubr.msk.bf16.vlgmr.msra.gmra.mxu0 %vm1635_vm1, %v2093_v43 }
 0x44f   : > { %2813 = vmatpush3.bf16.msra.mxu0 %v2984_v15  ;;  %2816 = vmatprep.mubr.msk.bf16.mxu0 %vm3312_vm0, %v3311_v0 }
 0x450   : > { %2809 = vmatmul.mubr.msk.bf16.vlgmr.msra.gmra.mxu1 %vm1635_vm1, %v2094_v19  ;;  %2814 = vmatprep.subr.bf16.mxu0 %v3311_v0 }
 0x451   : > { %2821 = vmatpush3.bf16.msra.mxu1 %v2986_v18  ;;  %2824 = vmatprep.mubr.msk.bf16.mxu1 %vm3312_vm0, %v3311_v0 }
 0x452   : > { %2822 = vmatprep.subr.bf16.mxu1 %v3311_v0 }
 0x453   : > { %2815 = vmatpush3.bf16.msra.mxu0 %v2985_v20 }
 0x455   : > { %2823 = vmatpush3.bf16.msra.mxu1 %v2987_v21 }
 0x46e   : > { %v2034_v25 = vpop.f32.mrf.mxu0 }
 0x46f   : > { %v2089_v31 = vmul.f32 %v3015_v28, %v2034_v25 }
 0x470   : > { %v2788_v26 = vpop.f32.mrf.mxu0 }
 0x472   : > { %v2037_v29 = vpop.f32.mrf.mxu0  ;;  %v2078_v30 = vpop.f32.mrf.mxu1 }
 0x473   : > { %v2090_v32 = vmul.f32 %v3013_v27, %v2037_v29  ;;  %v2091_v37 = vmul.f32 %v3017_v33, %v2078_v30 }
 0x474   : > { %v2789_v7 = vpop.f32.mrf.mxu0  ;;  %v2794_v0 = vpop.f32.mrf.mxu1 }
 0x475   : > { %v2095_v34 = vpack.c.bf16 %v2090_v32, %v2089_v31 }
 0x476   : > { %v2081_v36 = vpop.f32.mrf.mxu1 }
 0x477   : > { %v2092_v38 = vmul.f32 %v3019_v35, %v2081_v36  ;;  %2817 = vmatmul.mubr.msk.bf16.vlgmr.msra.gmra.mxu0 %vm1635_vm1, %v2095_v34 }
 0x478   : > { %v2795_v54 = vpop.f32.mrf.mxu1 }
 0x479   : > { %v2096_v40 = vpack.c.bf16 %v2092_v38, %v2091_v37 }
 0x47b   : > { %2825 = vmatmul.mubr.msk.bf16.vlgmr.msra.gmra.mxu1 %vm1635_vm1, %v2096_v40 }
 0x50e   : > { %v2162_v41 = vpop.f32.mrf.mxu0 }
 0x510   : > { %v2802_v39 = vpop.f32.mrf.mxu0  ;;  %v2218_v44 = vpop.f32.mrf.mxu1 }
 0x511   : > { %v2337_v42 = vadd.f32 %v2218_v44, %v2162_v41 }
 0x512   : > { %v2165_v46 = vpop.f32.mrf.mxu0  ;;  %v2810_v47 = vpop.f32.mrf.mxu1 }
 0x514   : > { %v2803_v49 = vpop.f32.mrf.mxu0  ;;  %v2221_v50 = vpop.f32.mrf.mxu1 }
 0x515   : > { %v2340_v58 = vadd.f32 %v2221_v50, %v2165_v46 }
 0x516   : > { %v2811_v52 = vpop.f32.mrf.mxu1 }
 0x537   : > { %v2274_v48 = vpop.f32.mrf.mxu0 }
 0x538   : > { %v2338_v51 = vadd.f32 %v2337_v42, %v2274_v48 }
 0x539   : > { %v2818_v53 = vpop.f32.mrf.mxu0 }
 0x53b   : > { %v2277_v55 = vpop.f32.mrf.mxu0  ;;  %v2330_v56 = vpop.f32.mrf.mxu1 }
 0x53c   : > { %v2339_v60 = vadd.f32 %v2338_v51, %v2330_v56  ;;  %v2341_v63 = vadd.f32 %v2340_v58, %v2277_v55 }
 0x53d   : > { %v2819_v61 = vpop.f32.mrf.mxu0  ;;  %v2826_v62 = vpop.f32.mrf.mxu1 }
 0x53e   : > { %v2350_v1 = vadd.f32 %v2623_v57, %v2339_v60 }
 0x53f   : > { %v2333_v2 = vpop.f32.mrf.mxu1 }
 0x540   : > { %2352 = vst [vmem:[%s476_s4] sm:$0xff] %v2350_v1  ;;  %v2342_v3 = vadd.f32 %v2341_v63, %v2333_v2 }
 0x541   : > { %v2827_v4 = vpop.f32.mrf.mxu1 }
 0x542   : > { %v2351_v5 = vadd.f32 %v2623_v57, %v2342_v3 }
 0x544   : > { %2353 = vst [vmem:[%s476_s4 + $0x8] sm:$0xff] %v2351_v5 }
 0x545   : > { %3221 = shalt.err (!%p3218_p0)
}
 0x546   : > { %s3222_s19 = scalar_lea.hbm %s3839_s14, 256  ;;  %s3226_s26 = scalar_lea.hbm %s3895_s8, 512 }
 0x547   : > { %p3223_p11 = scmp.ne.s32.totalorder %s3839_s14, %s3222_s19  ;;  %p3227_p8 = scmp.lt.s32.totalorder %s3839_s14, %s3895_s8 }
 0x548   : > { %p3228_p12 = scmp.lt.s32.totalorder %s3226_s26, %s3222_s19 }
 0x549   : > { %p3224_p10 = pnand %p3223_p11, %p3464_p7 }
 0x54a   : > { %p3229_p5 = por %p3228_p12, %p3227_p8 }
 0x54b   : > { %p3225_p1 = pneg %p3224_p10 }
 0x54d   : > { %p3230_p4 = pnand %p3229_p5, %p3225_p1 }
 0x54f   : > { %3233 = shalt.err (!%p3230_p4)
}
 0x550   : > { %s3320_s13 = smov 128   ;;  %s3321_s5 = smov 8  }
 0x551   : > { %2850 = dma.vmem_to_hbm [thread:$0]  (%p3464_p7), %s3834_s24, 256, %s3839_s14, %s2355_s27, %s3320_s13, %s3320_s13, %s3321_s5  }
 0x552 PF: > { %s3941_s1 = sld [smem:[#allocation20_spill]] }
 0x553   : > { %s3942_s25 = sld [smem:[#allocation23_spill]] }
 0x554   : > { %s3943_s16 = sld [smem:[#allocation22_spill]] }
 0x558   : > { %s2385_s4 = sand.u32 1, %s3941_s1  }
 0x559   : > { %p3944_p2 = scmp.ne.s32.totalorder %s3942_s25, 0  ;;  %s2386_s23 = scalar_lea.sflag [#allocation4], %s2385_s4 }
 0x55a   : > { %p3945_p3 = scmp.ge.s32.totalorder %s3943_s16, 2 }
 0x55c   : > { %p2876_p6 = pnand %p3945_p3, %p3944_p2 }
 0x55e   : > { %p2877_p9 = pneg %p2876_p6 }
 0x560   : > { %3275 = dma.done.wait (%p2877_p9), %s2386_s23, 256  }
 0x561   : > { %3277 = vsyncadd (%p2877_p9), %s2386_s23, 4294967040  ;;  %s29_s10 = sadd.s32 1, %s3943_s16   ;;  %s3946_s21 = sld [smem:[#allocation25_spill]] }
 0x562   : > { %p26_p13 = scmp.ge.s32.totalorder %s29_s10, 4   ;;  %s3947_s30 = sld [smem:[#allocation21_spill]] }
 0x563   : > { %s3948_s9 = sld [smem:[#allocation24_spill]]  ;;  %s3949_s27 = smov %s3284_s28 }
 0x564   : > { %s3950_s28 = smov %s3288_s29  ;;  %28 = sbr.rel (!%p26_p13) target bundleno = 15 (0xf), region = 137 }
 0x567   : > { %s3951_s29 = smov %s3946_s21 }
 0x569   :  { %2391 = vsyncpa [#allocation3], 1 }
 0x56a   :  { %2393 = vsyncpa [#allocation3 + $0x1], 1 }
 0x56b   :  { %2394 = vsyncpa [#allocation6], 1 }
 0x56c   :  { %2396 = vsyncpa [#allocation6 + $0x1], 1 }
 0x56d   :  { %2397 = vsyncpa [#allocation9], 1 }
 0x56e   :  { %2398 = vsyncpa [#allocation12], 1 }
 0x56f   :  { %2399 = vsyncpa [#allocation4], 1 }
 0x570   :  { %2401 = vsyncpa [#allocation4 + $0x1], 1 }

// kernel: tpu_custom_call.1
= control target key start
LH: loop header
LB: loop body
LE: loop exit
PB: predicated region body
PF: predicated region fallthrough
CT: control target
= control target key end

     0   :  { %s3887_s0 = inlined_call_operand.hbm [shape: bf16[2,16,128], index: 0, kind: input, shape index: {}]   ;;  %s3888_s1 = inlined_call_operand.hbm [shape: bf16[2,16,128], index: 1, kind: input, shape index: {}]   ;;  %s3889_s2 = inlined_call_operand.hbm [shape: bf16[2,16,128], index: 2, kind: input, shape index: {}]   ;;  %s3890_s3 = inlined_call_operand.hbm [shape: bf16[128,128], index: 3, kind: input, shape index: {}]   ;;  %s3891_s4 = inlined_call_operand.hbm [shape: bf16[128,128], index: 4, kind: input, shape index: {}]   ;;  %s3892_s5 = inlined_call_operand.hbm [shape: bf16[128,128], index: 5, kind: input, shape index: {}]   ;;  %s3893_s6 = inlined_call_operand.hbm [shape: bf16[4,32,128], index: 6, kind: input, shape index: {}]   ;;  %s3894_s7 = inlined_call_operand.vmem [shape: f32[1,128], index: 7, kind: input, shape index: {}]   ;;  %s3895_s8 = inlined_call_operand.hbm [shape: f32[2,16,128], index: 8, kind: output, shape index: {}]  }
   0x1   :  { %3910 = sst [smem:[#allocation26_spill]] %s3888_s1 }
   0x2   :  { %3911 = sst [smem:[#allocation27_spill]] %s3890_s3 }
   0x3   :  { %3912 = sst [smem:[#allocation28_spill]] %s3891_s4 }
   0x4   :  { %3913 = sst [smem:[#allocation29_spill]] %s3892_s5 }
   0x5   :  { %13 = vsyncpa [#allocation3], 0 }
   0x6   :  { %15 = vsyncpa [#allocation3 + $0x1], 0 }
   0x7   :  { %16 = vsyncpa [#allocation6], 0 }
   0x8   :  { %18 = vsyncpa [#allocation6 + $0x1], 0 }
   0x9   :  { %19 = vsyncpa [#allocation9], 0 }
   0xa   :  { %20 = vsyncpa [#allocation12], 0 }
   0xb   :  { %21 = vsyncpa [#allocation4], 0 }
   0xc   :  { %23 = vsyncpa [#allocation4 + $0x1], 0  ;;  %s3367_s27 = smov 0   ;;  %s3369_s28 = smov 0  }
   0xd   :  { %s3371_s29 = smov 0   ;;  %s3373_s30 = smov 0  }
   0xe   :  { %s3375_s9 = smov 0   ;;  %s3377_s10 = smov 0  }
   0xf LB: > { %3914 = sst [smem:[#allocation20_spill]] %s3280_s27  ;;  %s3398_s11 = sadd.s32 4294967295, %s3300_s10   ;;  %s3300_s10 = sphi %s3377_s10, %s29_s10   ;;  %s3296_s9 = sphi %s3375_s9, %s3948_s9   ;;  %s3292_s30 = sphi %s3373_s30, %s3947_s30   ;;  %s3288_s29 = sphi %s3371_s29, %s3951_s29   ;;  %s3284_s28 = sphi %s3369_s28, %s3950_s28   ;;  %s3280_s27 = sphi %s3367_s27, %s3949_s27  }
  0x10   : > { %3915 = sst [smem:[#allocation21_spill]] %s3296_s9  ;;  %s2539_s12 = sadd.s32 4294967294, %s3300_s10  }
  0x11   : > { %3916 = sst [smem:[#allocation22_spill]] %s3300_s10  ;;  %p63_p0 = scmp.ne.s32.totalorder %s3284_s28, %s3280_s27 }
  0x12   : > { %p3896_p1 = scmp.eq.s32.totalorder %s3398_s11, 0  ;;  %p246_p2 = scmp.eq.s32.totalorder %s3398_s11, 1 }
  0x13   : > { %p252_p3 = scmp.eq.s32.totalorder %s2539_s12, 1  ;;  %p2540_p5 = scmp.ge.s32.totalorder %s3300_s10, 1 }
  0x14   : > { %p3407_p4 = por %p3896_p1, %p63_p0  ;;  %p259_p7 = scmp.lt.s32.totalorder %s3300_s10, 3 }
  0x15   : > { %p3412_p6 = por %p252_p3, %p63_p0  ;;  %s3302_s16 = smov [#allocation8]  }
  0x16   : > { %p3417_p8 = pnand %p2540_p5, %p259_p7  ;;  %s271_s17 = sshll.u32 %s3302_s16, 4  ;;  %s272_s17 = int_to_ptr.vmem [resolvable:$true] %s271_s17 }
  0x17   : > { %s3918_s14 = scalar_select %p3412_p6, 1, 0 }
  0x18   : > { %p2852_p9 = pneg %p3417_p8  ;;  %s3303_s19 = smov [#allocation11]  }
  0x19   : > { %3919 = sst [smem:[#allocation23_spill]] %s3918_s14  ;;  %s297_s20 = sshll.u32 %s3303_s19, 4  ;;  %s298_s20 = int_to_ptr.vmem [resolvable:$true] %s297_s20 }
  0x1a   : > { %p3426_p11 = pnand %p2852_p9, %p3896_p1  ;;  %s3031_s21 = scalar_lea.vmem %s272_s17, 1024 }
  0x1b   : > { %p3032_p13 = scmp.ne.s32.totalorder %s272_s17, %s3031_s21  ;;  %p3039_p5 = scmp.lt.s32.totalorder %s272_s17, %s272_s17 }
  0x1c   : > { %p3906_p12 = pneg %p3426_p11  ;;  %p3040_p7 = scmp.lt.s32.totalorder %s3031_s21, %s3031_s21 }
  0x1e   : > { %p3034_p0 = pnand %p3032_p13, %p3906_p12  ;;  %p3041_p10 = por %p3040_p7, %p3039_p5 }
  0x20   : > { %p3035_p3 = pneg %p3034_p0 }
  0x22   : > { %p3042_p9 = pnand %p3041_p10, %p3035_p3 }
  0x24   : > { %3045 = shalt.err (!%p3042_p9)
}
  0x25   : > { %s3897_s22 = smov 64   ;;  %s3899_s23 = smov 4  }
  0x26   : > { %s3922_s3 = sld [smem:[#allocation27_spill]]  ;;  %s3057_s26 = scalar_lea.vmem %s298_s20, 1024 }
  0x27   : > { %p3058_p13 = scmp.ne.s32.totalorder %s298_s20, %s3057_s26  ;;  %p3065_p10 = scmp.lt.s32.totalorder %s298_s20, %s298_s20 }
  0x28   : > { %p3066_p3 = scmp.lt.s32.totalorder %s3057_s26, %s3057_s26 }
  0x29   : > { %p3060_p0 = pnand %p3058_p13, %p3906_p12 }
  0x2a   : > { %p3067_p7 = por %p3066_p3, %p3065_p10 }
  0x2b   : > { %p3061_p5 = pneg %p3060_p0 }
  0x2c   : > { %2855 = dma.hbm_to_vmem [thread:$0]  (!%p3426_p11), %s3922_s3, 1024, %s272_s17, [#allocation9], %s3897_s22, %s3897_s22, %s3899_s23  }
  0x2d   : > { %p3068_p9 = pnand %p3067_p7, %p3061_p5 }
  0x2f   : > { %3071 = shalt.err (!%p3068_p9)
}
  0x30   : > { %s3923_s5 = sld [smem:[#allocation29_spill]]  ;;  %s41_s17 = sadd.s32 1, %s3296_s9 }
  0x31   : > { %s50_s19 = sadd.s32 1, %s3288_s29  ;;  %p43_p13 = scmp.ge.s32.totalorder %s41_s17, 2 }
  0x32   : > { %p57_p0 = scmp.ne.s32.totalorder %s3288_s29, %s3284_s28  ;;  %p58_p5 = scmp.eq.s32.totalorder %s3300_s10, 0 }
  0x33   : > { %p2883_p10 = scmp.lt.s32.totalorder %s3300_s10, 2  ;;  %s3953_s17 = smov (%p43_p13, %s41_s17), 0 }
  0x34   : > { %3924 = sst [smem:[#allocation24_spill]] %s3953_s17  ;;  %p59_p3 = por %p58_p5, %p57_p0 }
  0x35   : > { %p3464_p7 = por %p246_p2, %p57_p0  ;;  %s45_s24 = ssub.s32 %s3296_s9, %s3953_s17 }
  0x36   : > { %2861 = dma.hbm_to_vmem [thread:$0]  (!%p3426_p11), %s3923_s5, 1024, %s298_s20, [#allocation12], %s3897_s22, %s3897_s22, %s3899_s23  }
  0x37   : > { %s3901_s25 = sand.u32 1, %s3288_s29   ;;  %p48_p9 = scmp.eq.s32.totalorder %s45_s24, 0 }
  0x38   : > { %s3473_s20 = sshll.u32 %s3901_s25, 3  ;;  %s3476_s26 = sshll.u32 %s3296_s9, 7 }
  0x39   : > { %p3478_p1 = pnand %p2883_p10, %p59_p3  ;;  %s350_s22 = sand.u32 1, %s3300_s10  }
  0x3a   : > { %s3483_s16 = scalar_select %p48_p9, %s3288_s29, %s50_s19  }
  0x3b   : > { %s3928_s1 = sld [smem:[#allocation26_spill]]  ;;  %s354_s5 = scalar_lea.vmem [#allocation5], %s3473_s20 }
  0x3c   : > { %3927 = sst [smem:[#allocation25_spill]] %s3483_s16  ;;  %s361_s25 = sshll.u32 %s354_s5, 4  ;;  %s362_s25 = int_to_ptr.vmem [resolvable:$true] %s361_s25 }
  0x3d   : > { %s3491_s17 = scalar_lea.sflag [#allocation6], %s350_s22  ;;  %p3908_p2 = pneg %p3478_p1 }
  0x3e   : > { %s3085_s9 = scalar_lea.vmem %s362_s25, 128  ;;  %s3306_s19 = smov [#allocation5]  }
  0x3f   : > { %p3086_p13 = scmp.ne.s32.totalorder %s362_s25, %s3085_s9  ;;  %s3090_s16 = sshll.u32 %s3306_s19, 4  ;;  %s3091_s16 = int_to_ptr.vmem [resolvable:$false] %s3090_s16 }
  0x40   : > { %s3092_s10 = scalar_lea.vmem %s3091_s16, 256  ;;  %p3093_p10 = scmp.lt.s32.totalorder %s362_s25, %s3091_s16 }
  0x41   : > { %s360_s24 = scalar_lea.hbm %s3928_s1, %s3476_s26  ;;  %p3088_p0 = pnand %p3086_p13, %p3908_p2 }
  0x42   : > { %p3094_p3 = scmp.lt.s32.totalorder %s3092_s10, %s3085_s9 }
  0x43   : > { %p3089_p5 = pneg %p3088_p0 }
  0x44   : > { %p3095_p9 = por %p3094_p3, %p3093_p10 }
  0x46   : > { %p3096_p12 = pnand %p3095_p9, %p3089_p5 }
  0x48   : > { %3099 = shalt.err (!%p3096_p12)
}
  0x49   : > { %s3929_s3 = smov 4   ;;  %s3930_s5 = smov 64  }
  0x4a   : > { %2871 = dma.hbm_to_vmem [thread:$0]  (!%p3478_p1), %s360_s24, 128, %s362_s25, %s3491_s17, %s3930_s5, %s3930_s5, %s3929_s3  }
  0x4b   : > { %s3307_s22 = smov [#allocation10]   ;;  %s3308_s1 = smov [#allocation13]  }
  0x4c   : > { %s284_s23 = sshll.u32 %s3307_s22, 4  ;;  %s310_s19 = sshll.u32 %s3308_s1, 4  ;;  %s285_s23 = int_to_ptr.vmem [resolvable:$true] %s284_s23  ;;  %s311_s19 = int_to_ptr.vmem [resolvable:$true] %s310_s19 }
  0x4d   : > { %s3111_s14 = scalar_lea.vmem %s285_s23, 1024  ;;  %p3931_p0 = pneg %p3426_p11 }
  0x4e   : > { %p3112_p13 = scmp.ne.s32.totalorder %s285_s23, %s3111_s14  ;;  %p3119_p12 = scmp.lt.s32.totalorder %s285_s23, %s285_s23 }
  0x4f   : > { %p3120_p3 = scmp.lt.s32.totalorder %s3111_s14, %s3111_s14 }
  0x50   : > { %p3114_p10 = pnand %p3112_p13, %p3931_p0 }
  0x51   : > { %p3121_p9 = por %p3120_p3, %p3119_p12 }
  0x52   : > { %p3115_p5 = pneg %p3114_p10 }
  0x54   : > { %p3122_p2 = pnand %p3121_p9, %p3115_p5 }
  0x56   : > { %3125 = shalt.err (!%p3122_p2)
}
  0x57   : > { %s3932_s4 = sld [smem:[#allocation28_spill]]  ;;  %s3137_s1 = scalar_lea.vmem %s311_s19, 1024 }
  0x58   : > { %p3138_p6 = scmp.ne.s32.totalorder %s311_s19, %s3137_s1  ;;  %p3933_p13 = pmov %p3931_p0 }
  0x59   : > { %p3145_p12 = scmp.lt.s32.totalorder %s311_s19, %s311_s19  ;;  %p3146_p5 = scmp.lt.s32.totalorder %s3137_s1, %s3137_s1 }
  0x5a   : > { %p3140_p0 = pnand %p3138_p6, %p3933_p13 }
  0x5b   : > { %p3147_p2 = por %p3146_p5, %p3145_p12 }
  0x5c   : > { %p3141_p10 = pneg %p3140_p0 }
  0x5d   : > { %2858 = dma.hbm_to_vmem [thread:$0]  (!%p3426_p11), %s3932_s4, 1024, %s285_s23, [#allocation9], %s3930_s5, %s3930_s5, %s3929_s3  }
  0x5e   : > { %p3148_p3 = pnand %p3147_p2, %p3141_p10 }
  0x60   : > { %3151 = shalt.err (!%p3148_p3)
}
  0x61   : > { %2864 = dma.hbm_to_vmem [thread:$0]  (!%p3426_p11), %s3893_s6, 1024, %s311_s19, [#allocation12], %s3930_s5, %s3930_s5, %s3929_s3  }
  0x62   : > { %s339_s22 = scalar_lea.hbm %s3887_s0, %s3476_s26  ;;  %s331_s23 = scalar_lea.vmem [#allocation2], %s3473_s20 }
  0x63   : > { %s340_s9 = sshll.u32 %s331_s23, 4  ;;  %s381_s1 = scalar_lea.hbm %s3889_s2, %s3476_s26  ;;  %s341_s9 = int_to_ptr.vmem [resolvable:$true] %s340_s9 }
  0x64   : > { %s3934_s4 = sand.u32 1, %s3288_s29   ;;  %s3165_s14 = scalar_lea.vmem %s341_s9, 128 }
  0x65   : > { %s328_s27 = scalar_lea.sflag [#allocation3], %s3934_s4  ;;  %p3166_p6 = scmp.ne.s32.totalorder %s341_s9, %s3165_s14 }
  0x66   : > { %p3935_p9 = pneg %p3478_p1  ;;  %s3309_s19 = smov [#allocation2]  }
  0x67   : > { %s3170_s25 = sshll.u32 %s3309_s19, 4  ;;  %s3171_s25 = int_to_ptr.vmem [resolvable:$false] %s3170_s25 }
  0x68   : > { %p3168_p13 = pnand %p3166_p6, %p3935_p9  ;;  %s3172_s16 = scalar_lea.vmem %s3171_s25, 256 }
  0x69   : > { %p3173_p11 = scmp.lt.s32.totalorder %s341_s9, %s3171_s25  ;;  %p3174_p10 = scmp.lt.s32.totalorder %s3172_s16, %s3165_s14 }
  0x6a   : > { %p3169_p0 = pneg %p3168_p13 }
  0x6b   : > { %p3175_p12 = por %p3174_p10, %p3173_p11 }
  0x6d   : > { %p3176_p5 = pnand %p3175_p12, %p3169_p0 }
  0x6f   : > { %3179 = shalt.err (!%p3176_p5)
}
  0x70   : > { %2868 = dma.hbm_to_vmem [thread:$0]  (!%p3478_p1), %s339_s22, 128, %s341_s9, %s328_s27, %s3930_s5, %s3930_s5, %s3929_s3  }
  0x71   : > { %s375_s4 = scalar_lea.vmem [#allocation7], %s3473_s20  ;;  %p3936_p3 = pmov %p3935_p9 }
  0x72   : > { %s382_s24 = sshll.u32 %s375_s4, 4  ;;  %s3310_s18 = smov [#allocation7]   ;;  %s383_s24 = int_to_ptr.vmem [resolvable:$true] %s382_s24 }
  0x73   : > { %s3193_s23 = scalar_lea.vmem %s383_s24, 128  ;;  %s3198_s10 = sshll.u32 %s3310_s18, 4  ;;  %s3199_s10 = int_to_ptr.vmem [resolvable:$false] %s3198_s10 }
  0x74   : > { %p3194_p2 = scmp.ne.s32.totalorder %s383_s24, %s3193_s23  ;;  %s3200_s14 = scalar_lea.vmem %s3199_s10, 256 }
  0x75   : > { %p3201_p13 = scmp.lt.s32.totalorder %s383_s24, %s3199_s10  ;;  %p3202_p0 = scmp.lt.s32.totalorder %s3200_s14, %s3193_s23 }
  0x76   : > { %p3196_p6 = pnand %p3194_p2, %p3936_p3 }
  0x77   : > { %p3203_p11 = por %p3202_p0, %p3201_p13 }
  0x78   : > { %p3197_p9 = pneg %p3196_p6 }
  0x7a   : > { %p3204_p10 = pnand %p3203_p11, %p3197_p9 }
  0x7c   : > { %3207 = shalt.err (!%p3204_p10)
}
  0x7d   : > { %2874 = dma.hbm_to_vmem [thread:$0]  (!%p3478_p1), %s381_s1, 128, %s383_s24, %s3491_s17, %s3930_s5, %s3930_s5, %s3929_s3  }
  0x7e   : > { %394 = sbr.rel (%p3417_p8) target bundleno = 1362 (0x552), region = 52  ;;  %s3563_s22 = sand.u32 (!%p3417_p8), 1, %s3284_s28  }
  0x7f   : > { %s3566_s12 = sshll.u32 (!%p3417_p8), %s3563_s22, 3  ;;  %s397_s9 = scalar_lea.sflag (!%p3417_p8), [#allocation3], %s3563_s22 }
  0x80   : > { %s400_s19 = scalar_lea.vmem (!%p3417_p8), [#allocation2], %s3566_s12 }
  0x83   : > { %3259 = dma.done.wait (%p3407_p4), %s397_s9, 128  }
  0x84   : > { %3261 = vsyncadd (%p3407_p4), %s397_s9, 4294967168  ;;  %s405_s15 = sand.u32 1, %s3398_s11   ;;  %s409_s26 = scalar_lea.vmem [#allocation5], %s3566_s12 }
  0x85   : > { %s406_s17 = scalar_lea.sflag [#allocation6], %s405_s15 }
  0x86   : > { %3263 = dma.done.wait (%p3407_p4), %s406_s17, 256  }
  0x87   : > { %3265 = vsyncadd (%p3407_p4), %s406_s17, 4294967040  ;;  %s418_s3 = scalar_lea.vmem [#allocation7], %s3566_s12  ;;  %p3937_p1 = scmp.eq.s32.totalorder %s3398_s11, 0 }
  0x89   : > { %3267 = dma.done.wait (%p3937_p1), [#allocation9], 2048   ;;  %p3938_p8 = pmov %p3937_p1 }
  0x8a   : > { %p3939_p12 = pmov %p3937_p1 }
  0x8b   : > { %3269 = vsyncadd (%p3938_p8), [#allocation9], 4294965248 }
  0x8c   : > { %3271 = dma.done.wait (%p3939_p12), [#allocation12], 2048   ;;  %p3940_p5 = pmov %p3937_p1 }
  0x8d   : > { %v3311_v0 = vmov 0.0   ;;  %vm3312_vm0 = vmmov 0   ;;  %v2953_v1 = vld [vmem:[#allocation10 + $0x38] sm:$0xff]   ;;  %v2955_v3 = vld [vmem:[#allocation10 + $0x30] sm:$0xff]   ;;  %v2957_v5 = vld [vmem:[#allocation10 + $0x28] sm:$0xff]   ;;  %s3313_s11 = smov 32   ;;  %v855_v47 = vlaneseq }
  0x8e   : > { %3273 = vsyncadd (%p3940_p5), [#allocation12], 4294965248  ;;  %2708 = vmatprep.subr.bf16.mxu1 %v3311_v0  ;;  %2688 = vmatprep.subr.bf16.mxu0 %v3311_v0  ;;  %v2954_v2 = vld [vmem:[#allocation8 + $0x38] sm:$0xff]   ;;  %v2956_v4 = vld [vmem:[#allocation8 + $0x30] sm:$0xff]   ;;  %s3314_s13 = smov 96   ;;  %s3315_s5 = smov 64  }
  0x8f   : > { %2724 = vmatprep.mubr.msk.bf16.mxu1 %vm3312_vm0, %v3311_v0  ;;  %2704 = vmatprep.mubr.msk.bf16.mxu0 %vm3312_vm0, %v3311_v0  ;;  %v2958_v6 = vld [vmem:[#allocation8 + $0x28] sm:$0xff]   ;;  %v2959_v7 = vld [vmem:[#allocation10 + $0x20] sm:$0xff]   ;;  %v2961_v9 = vld [vmem:[#allocation10 + $0x18] sm:$0xff]   ;;  %v3316_v45 = vmov 1983009808   ;;  %v856_v49 = vshrl.u32 %v855_v47, 7 }
  0x90   : > { %2709 = vmatpush3.bf16.msra.mxu1 %v2953_v1  ;;  %2689 = vmatpush3.bf16.msra.mxu0 %v2954_v2  ;;  %v2960_v8 = vld [vmem:[#allocation8 + $0x20] sm:$0xff]   ;;  %v2962_v10 = vld [vmem:[#allocation8 + $0x18] sm:$0xff]   ;;  %v2963_v11 = vld [vmem:[#allocation10 + $0x10] sm:$0xff]   ;;  %v853_v46 = vunpack.c.l.s4 %v3316_v45  ;;  %v3317_v50 = vmov 1934713408   ;;  %v3318_v53 = vmov 0  }
  0x91   : > { %2710 = vmatprep.subr.bf16.mxu1 %v3311_v0  ;;  %2690 = vmatprep.subr.bf16.mxu0 %v3311_v0  ;;  %v2964_v12 = vld [vmem:[#allocation8 + $0x10] sm:$0xff]   ;;  %v2965_v13 = vld [vmem:[#allocation10 + $0x8] sm:$0xff]   ;;  %v2967_v15 = vld [vmem:[#allocation10] sm:$0xff]   ;;  %v884_v51 = vunpack.c.l.s4 %v3317_v50  ;;  %v3637_v54 = vpack.i.b16 %v3318_v53, %v3318_v53  ;;  %vm1635_vm1 = vcmask 261120   ;;  %vm1824_vm2 = vcmask 130048   ;;  %s2563_s1 = sshll.u32 %s3563_s22, 4 }
  0x92   : > { %v2966_v14 = vld [vmem:[#allocation8 + $0x8] sm:$0xff]   ;;  %v2968_v16 = vld [vmem:[#allocation8] sm:$0xff]   ;;  %v2970_v18 = vld [vmem:[%s400_s19] sm:$0xff]   ;;  %v854_v48 = vunpack.c.0.s8 %v853_v46  ;;  %s476_s4 = scalar_lea.vmem [#allocation14], %s2563_s1  ;;  %s2632_s23 = sshll.u32 %s3292_s30, 8 }
  0x93   : > { %v2969_v17 = vld [vmem:[%s409_s26] sm:$0xff]   ;;  %v2971_v19 = vld [vmem:[#allocation11 + $0x38] sm:$0xff]   ;;  %v2972_v20 = vld [vmem:[#allocation11 + $0x30] sm:$0xff]   ;;  %v885_v61 = vunpack.c.0.s8 %v884_v51  ;;  %s2370_s24 = sshll.u32 %s476_s4, 4  ;;  %s3839_s14 = scalar_lea.hbm %s3895_s8, %s2632_s23  ;;  %s3834_s24 = int_to_ptr.vmem [resolvable:$true] %s2370_s24 }
  0x94   : > { %2711 = vmatpush3.bf16.msra.mxu1 %v2955_v3  ;;  %2691 = vmatpush3.bf16.msra.mxu0 %v2956_v4  ;;  %v2973_v21 = vld [vmem:[#allocation11 + $0x28] sm:$0xff]   ;;  %v2974_v22 = vld [vmem:[#allocation11 + $0x20] sm:$0xff]   ;;  %v2975_v23 = vld [vmem:[#allocation11 + $0x18] sm:$0xff]   ;;  %v3639_v59 = vsub.s32 %v854_v48, %v856_v49  ;;  %s2355_s27 = scalar_lea.sflag [#allocation4], %s3563_s22  ;;  %s3208_s20 = scalar_lea.vmem %s3834_s24, 256 }
  0x95   : > { %2712 = vmatprep.subr.bf16.mxu1 %v3311_v0  ;;  %2692 = vmatprep.subr.bf16.mxu0 %v3311_v0  ;;  %v2976_v24 = vld [vmem:[#allocation11 + $0x10] sm:$0xff]   ;;  %v2977_v25 = vld [vmem:[#allocation11 + $0x8] sm:$0xff]   ;;  %v2978_v26 = vld [vmem:[#allocation11] sm:$0xff]   ;;  %p3209_p4 = scmp.ne.s32.totalorder %s3834_s24, %s3208_s20  ;;  %s3319_s30 = smov [#allocation14]  }
  0x96   : > { %v2979_v27 = vld [vmem:[%s418_s3] sm:$0xff]   ;;  %s3212_s12 = sshll.u32 %s3319_s30, 4  ;;  %s3213_s12 = int_to_ptr.vmem [resolvable:$false] %s3212_s12 }
  0x97   : > { %p3210_p2 = pnand %p3209_p4, %p3464_p7  ;;  %s3214_s9 = scalar_lea.vmem %s3213_s12, 512 }
  0x98   : > { %2713 = vmatpush3.bf16.msra.mxu1 %v2957_v5  ;;  %2693 = vmatpush3.bf16.msra.mxu0 %v2958_v6  ;;  %p3215_p6 = scmp.lt.s32.totalorder %s3834_s24, %s3213_s12  ;;  %p3216_p9 = scmp.lt.s32.totalorder %s3214_s9, %s3208_s20 }
  0x99   : > { %2714 = vmatprep.subr.bf16.mxu1 %v3311_v0  ;;  %2694 = vmatprep.subr.bf16.mxu0 %v3311_v0  ;;  %p3211_p3 = pneg %p3210_p2 }
  0x9a   : > { %p3217_p13 = por %p3216_p9, %p3215_p6 }
  0x9c   : > { %2715 = vmatpush3.bf16.msra.mxu1 %v2959_v7  ;;  %2695 = vmatpush3.bf16.msra.mxu0 %v2960_v8  ;;  %v3644_v7 = vsub.s32 %v885_v61, %v856_v49  ;;  %p3218_p0 = pnand %p3217_p13, %p3211_p3 }
  0x9d   : > { %2716 = vmatprep.subr.bf16.mxu1 %v3311_v0  ;;  %2696 = vmatprep.subr.bf16.mxu0 %v3311_v0 }
  0xa0   : > { %2717 = vmatpush3.bf16.msra.mxu1 %v2961_v9  ;;  %2697 = vmatpush3.bf16.msra.mxu0 %v2962_v10 }
  0xa1   : > { %2718 = vmatprep.subr.bf16.mxu1 %v3311_v0  ;;  %2698 = vmatprep.subr.bf16.mxu0 %v3311_v0 }
  0xa4   : > { %2719 = vmatpush3.bf16.msra.mxu1 %v2963_v11  ;;  %2699 = vmatpush3.bf16.msra.mxu0 %v2964_v12 }
  0xa5   : > { %2720 = vmatprep.subr.bf16.mxu1 %v3311_v0  ;;  %2700 = vmatprep.subr.bf16.mxu0 %v3311_v0 }
  0xa8   : > { %2721 = vmatpush3.bf16.msra.mxu1 %v2965_v13  ;;  %2701 = vmatpush3.bf16.msra.mxu0 %v2966_v14 }
  0xa9   : > { %2722 = vmatprep.subr.bf16.mxu1 %v3311_v0  ;;  %2702 = vmatprep.subr.bf16.mxu0 %v3311_v0 }
  0xac   : > { %2723 = vmatpush3.bf16.msra.mxu1 %v2967_v15  ;;  %2703 = vmatpush3.bf16.msra.mxu0 %v2968_v16 }
  0xad   : > { %2748 = vmatprep.subr.bf16.mxu1 %v3311_v0  ;;  %2728 = vmatprep.subr.bf16.mxu0 %v3311_v0 }
  0xaf   : > { %2725 = vmatmul.mubr.bf16.vlgmr.msra.gmra.mxu1 %v2969_v17  ;;  %2705 = vmatmul.mubr.bf16.vlgmr.msra.gmra.mxu0 %v2970_v18 }
  0xb0   : > { %2750 = vmatprep.mubr.msk.bf16.mxu1 %vm3312_vm0, %v3311_v0  ;;  %2729 = vmatpush3.bf16.msra.mxu0 %v2971_v19 }
  0xb1   : > { %2744 = vmatprep.mubr.msk.bf16.mxu0 %vm3312_vm0, %v3311_v0  ;;  %2730 = vmatprep.subr.bf16.mxu0 %v3311_v0 }
  0xb4   : > { %2731 = vmatpush3.bf16.msra.mxu0 %v2972_v20 }
  0xb5   : > { %2732 = vmatprep.subr.bf16.mxu0 %v3311_v0 }
  0xb8   : > { %2733 = vmatpush3.bf16.msra.mxu0 %v2973_v21 }
  0xb9   : > { %2734 = vmatprep.subr.bf16.mxu0 %v3311_v0 }
  0xbc   : > { %2735 = vmatpush3.bf16.msra.mxu0 %v2974_v22 }
  0xbd   : > { %2736 = vmatprep.subr.bf16.mxu0 %v3311_v0 }
  0xc0   : > { %2737 = vmatpush3.bf16.msra.mxu0 %v2975_v23 }
  0xc1   : > { %2738 = vmatprep.subr.bf16.mxu0 %v3311_v0 }
  0xc4   : > { %2739 = vmatpush3.bf16.msra.mxu0 %v2976_v24 }
  0xc5   : > { %2740 = vmatprep.subr.bf16.mxu0 %v3311_v0 }
  0xc8   : > { %2741 = vmatpush3.bf16.msra.mxu0 %v2977_v25 }
  0xc9   : > { %2742 = vmatprep.subr.bf16.mxu0 %v3311_v0 }
  0xcc   : > { %2743 = vmatpush3.bf16.msra.mxu0 %v2978_v26 }
  0xcd   : > { %2772 = vmatprep.subr.bf16.mxu0 %v3311_v0 }
  0xcf   : > { %2745 = vmatmul.mubr.bf16.vlgmr.msra.gmra.mxu0 %v2979_v27 }
  0xd0   : > { %2774 = vmatprep.mubr.msk.bf16.mxu0 %vm3312_vm0, %v3311_v0 }
 0x16f   : > { %v703_v28 = vpop.f32.mrf.mxu1  ;;  %v590_v29 = vpop.f32.mrf.mxu0 }
 0x170   : > { %v597_v32 = vmul.f32 0.17677669, %v590_v29 }
 0x171   : > { %v2726_v30 = vpop.f32.mrf.mxu1  ;;  %v2706_v31 = vpop.f32.mrf.mxu0 }
 0x173   : > { %v706_v33 = vpop.f32.mrf.mxu1  ;;  %v593_v35 = vpop.f32.mrf.mxu0 }
 0x174   : > { %v1095_v34 = vpack.c.bf16 %v706_v33, %v703_v28  ;;  %v598_v36 = vmul.f32 0.17677669, %v593_v35 }
 0x175   : > { %v2727_v37 = vpop.f32.mrf.mxu1  ;;  %v2707_v38 = vpop.f32.mrf.mxu0 }
 0x176   : > { %1101 = vrot.lane.b32.xlu1 %v1095_v34, %s3313_s11  ;;  %1097 = vrot.lane.b32.xlu0 %v1095_v34, %s3314_s13  ;;  %v821_v39 = vpack.c.bf16 %v598_v36, %v597_v32  ;;  %v1107_v57 = vshrl.u32 %v1095_v34, 16 }
 0x178   : > { %v833_v12 = vshrl.u32 %v821_v39, 16 }
 0x17a   : > { %1099 = vrot.lane.b32.xlu0 %v1095_v34, %s3315_s5  ;;  %823 = vrot.lane.b32.xlu1 %v821_v39, %s3314_s13 }
 0x17e   : > { %825 = vrot.lane.b32.xlu0 %v821_v39, %s3315_s5  ;;  %827 = vrot.lane.b32.xlu1 %v821_v39, %s3313_s11 }
 0x18f   : > { %v814_v40 = vpop.f32.mrf.mxu0 }
 0x191   : > { %v2746_v41 = vpop.f32.mrf.mxu0 }
 0x193   : > { %v817_v42 = vpop.f32.mrf.mxu0 }
 0x194   : > { %v3633_v43 = vpack.c.bf16 %v817_v42, %v814_v40 }
 0x195   : > { %v2747_v44 = vpop.f32.mrf.mxu0 }
 0x196   : > { %1365 = vrot.lane.b32.xlu1 %v3633_v43, %s3314_s13  ;;  %1367 = vrot.lane.b32.xlu0 %v3633_v43, %s3315_s5 }
 0x1e8   : > { %v1102_v52 = vpop.permute.xlu1 %1101  ;;  %v1098_v55 = vpop.permute.xlu0 %1097 }
 0x1e9   : > { %v1105_v56 = vpack.i.b16 %v1098_v55, %v1095_v34  ;;  %v1108_v58 = vshrl.u32 %v1098_v55, 16  ;;  %v1116_v3 = vshrl.u32 %v1102_v52, 16 }
 0x1eb   : > { %v1109_v60 = vpack.i.b16 %v1108_v58, %v1107_v57  ;;  %v1119_v62 = vcombine.high %v1105_v56, %v3637_v54  ;;  %v1126_v6 = vrot.slane %v1105_v56, %v3639_v59 }
 0x1ec   : > { %v1100_v63 = vpop.permute.xlu0 %1099  ;;  %v824_v2 = vpop.permute.xlu1 %823 }
 0x1ed   : > { %v1113_v1 = vpack.i.b16 %v1102_v52, %v1100_v63  ;;  %v1185_v4 = vcombine.high %v1109_v60, %v3637_v54  ;;  %v1115_v5 = vshrl.u32 %v1100_v63, 16  ;;  %v1133_v10 = vrot.slane %v1119_v62, %v3639_v59 }
 0x1ee   : > { %v834_v13 = vshrl.u32 %v824_v2, 16  ;;  %v1192_v14 = vrot.slane %v1109_v60, %v3639_v59  ;;  %v831_v21 = vpack.i.b16 %v824_v2, %v821_v39 }
 0x1ef   : > { %v1134_v8 = vcombine.high %v1113_v1, %v3637_v54  ;;  %v1141_v9 = vrot.slane %v1113_v1, %v3639_v59  ;;  %v1117_v11 = vpack.i.b16 %v1116_v3, %v1115_v5  ;;  %v1199_v18 = vrot.slane %v1185_v4, %v3639_v59 }
 0x1f0   : > { %v835_v29 = vpack.i.b16 %v834_v13, %v833_v12  ;;  %v826_v30 = vpop.permute.xlu0 %825  ;;  %v828_v39 = vpop.permute.xlu1 %827  ;;  %v851_v44 = vcombine.high %v831_v21, %v3637_v54  ;;  %v858_v45 = vrot.slane %v831_v21, %v3639_v59 }
 0x1f1   : > { %v1148_v15 = vrot.slane %v1134_v8, %v3639_v59  ;;  %v1149_v16 = vcombine.low %v1126_v6, %v1141_v9  ;;  %v1150_v17 = vcombine.high %v1126_v6, %v1141_v9  ;;  %v1200_v19 = vcombine.high %v1117_v11, %v3637_v54 }
 0x1f2   : > { %v1207_v20 = vrot.slane %v1117_v11, %v3639_v59  ;;  %v841_v42 = vshrl.u32 %v826_v30, 16  ;;  %v917_v46 = vcombine.high %v835_v29, %v3637_v54  ;;  %v839_v49 = vpack.i.b16 %v828_v39, %v826_v30 }
 0x1f3   : > { %v1157_v22 = vrot.slane %v1149_v16, %v3644_v7  ;;  %v1164_v23 = vrot.slane %v1150_v17, %v3644_v7  ;;  %v1165_v24 = vcombine.low %v1133_v10, %v1148_v15  ;;  %v1166_v25 = vcombine.high %v1133_v10, %v1148_v15 }
 0x1f4   : > { %v1214_v26 = vrot.slane %v1200_v19, %v3639_v59  ;;  %v1215_v27 = vcombine.low %v1192_v14, %v1207_v20  ;;  %v1216_v28 = vcombine.high %v1192_v14, %v1207_v20  ;;  %v842_v50 = vshrl.u32 %v828_v39, 16 }
 0x1f5   : > { %v1173_v31 = vrot.slane %v1165_v24, %v3644_v7  ;;  %v1180_v32 = vrot.slane %v1166_v25, %v3644_v7  ;;  %v1251_v33 = vcombine.low %v1157_v22, %v1164_v23  ;;  %v2595_v34 = vcombine.high %v1157_v22, %v1164_v23 }
 0x1f6   : > { %v1223_v35 = vrot.slane %v1215_v27, %v3644_v7  ;;  %v1230_v36 = vrot.slane %v1216_v28, %v3644_v7  ;;  %v1231_v37 = vcombine.low %v1199_v18, %v1214_v26  ;;  %v1232_v38 = vcombine.high %v1199_v18, %v1214_v26 }
 0x1f7   : > { %v1267_v40 = vcombine.low %v1173_v31, %v1180_v32  ;;  %v2596_v41 = vcombine.high %v1173_v31, %v1180_v32  ;;  %v1258_v47 = vrot.slane %v1251_v33, %v3639_v59  ;;  %v1266_v48 = vrot.slane %v2595_v34, %v3639_v59 }
 0x1f8   : > { %v1239_v51 = vrot.slane %v1231_v37, %v3644_v7  ;;  %v1246_v52 = vrot.slane %v1232_v38, %v3644_v7  ;;  %v1301_v53 = vcombine.low %v1223_v35, %v1230_v36  ;;  %v843_v56 = vpack.i.b16 %v842_v50, %v841_v42 }
 0x1f9   : > { %v1274_v55 = vrot.slane %v1267_v40, %v3639_v59  ;;  %v866_v57 = vcombine.high %v839_v49, %v3637_v54  ;;  %v873_v58 = vrot.slane %v839_v49, %v3639_v59  ;;  %v1282_v60 = vrot.slane %v2596_v41, %v3639_v59 }
 0x1fa   : > { %v2597_v61 = vcombine.high %v1223_v35, %v1230_v36  ;;  %v865_v62 = vrot.slane %v851_v44, %v3639_v59  ;;  %v924_v63 = vrot.slane %v835_v29, %v3639_v59  ;;  %v931_v1 = vrot.slane %v917_v46, %v3639_v59 }
 0x1fb   : > { %v880_v2 = vrot.slane %v866_v57, %v3639_v59  ;;  %v881_v3 = vcombine.low %v858_v45, %v873_v58  ;;  %v882_v4 = vcombine.high %v858_v45, %v873_v58  ;;  %v932_v5 = vcombine.high %v843_v56, %v3637_v54 }
 0x1fc   : > { %v1317_v6 = vcombine.low %v1239_v51, %v1246_v52  ;;  %v2598_v8 = vcombine.high %v1239_v51, %v1246_v52  ;;  %v939_v9 = vrot.slane %v843_v56, %v3639_v59  ;;  %v1283_v10 = vcombine.low %v1258_v47, %v1266_v48 }
 0x1fd   : > { %v897_v11 = vcombine.low %v865_v62, %v880_v2  ;;  %v898_v12 = vcombine.high %v865_v62, %v880_v2  ;;  %v1291_v13 = vcombine.low %v1274_v55, %v1282_v60  ;;  %v1308_v14 = vrot.slane %v1301_v53, %v3639_v59 }
 0x1fe   : > { %v946_v15 = vrot.slane %v932_v5, %v3639_v59  ;;  %v947_v16 = vcombine.low %v924_v63, %v939_v9  ;;  %v948_v17 = vcombine.high %v924_v63, %v939_v9  ;;  %v1316_v18 = vrot.slane %v2597_v61, %v3639_v59 }
 0x1ff   : > { %v889_v19 = vrot.slane %v881_v3, %v3644_v7  ;;  %v896_v20 = vrot.slane %v882_v4, %v3644_v7  ;;  %v905_v21 = vrot.slane %v897_v11, %v3644_v7  ;;  %v912_v22 = vrot.slane %v898_v12, %v3644_v7 }
 0x200   : > { %v955_v23 = vrot.slane %v947_v16, %v3644_v7  ;;  %v962_v24 = vrot.slane %v948_v17, %v3644_v7  ;;  %v963_v25 = vcombine.low %v931_v1, %v946_v15  ;;  %v964_v26 = vcombine.high %v931_v1, %v946_v15 }
 0x201   : > { %v999_v27 = vcombine.low %v905_v21, %v912_v22  ;;  %v2592_v28 = vcombine.high %v905_v21, %v912_v22  ;;  %v1324_v29 = vrot.slane %v1317_v6, %v3639_v59  ;;  %v1332_v30 = vrot.slane %v2598_v8, %v3639_v59 }
 0x202   : > { %v971_v31 = vrot.slane %v963_v25, %v3644_v7  ;;  %v978_v32 = vrot.slane %v964_v26, %v3644_v7  ;;  %v1033_v33 = vcombine.low %v955_v23, %v962_v24  ;;  %v2593_v34 = vcombine.high %v955_v23, %v962_v24 }
 0x203   : > { %v983_v35 = vcombine.low %v889_v19, %v896_v20  ;;  %v2591_v36 = vcombine.high %v889_v19, %v896_v20  ;;  %v1333_v37 = vcombine.low %v1308_v14, %v1316_v18  ;;  %v1006_v38 = vrot.slane %v999_v27, %v3639_v59 }
 0x204   : > { %v1049_v39 = vcombine.low %v971_v31, %v978_v32  ;;  %v2594_v40 = vcombine.high %v971_v31, %v978_v32  ;;  %v1298_v41 = vrot.slane %v1291_v13, %v3644_v7  ;;  %v1014_v42 = vrot.slane %v2592_v28, %v3639_v59 }
 0x205   : > { %v1040_v44 = vrot.slane %v1033_v33, %v3639_v59  ;;  %v1048_v45 = vrot.slane %v2593_v34, %v3639_v59  ;;  %v1341_v46 = vcombine.low %v1324_v29, %v1332_v30  ;;  %v1290_v49 = vrot.slane %v1283_v10, %v3644_v7 }
 0x206   : > { %v1056_v47 = vrot.slane %v1049_v39, %v3639_v59  ;;  %v1064_v48 = vrot.slane %v2594_v40, %v3639_v59  ;;  %v990_v50 = vrot.slane %v983_v35, %v3639_v59  ;;  %v998_v51 = vrot.slane %v2591_v36, %v3639_v59 }
 0x207   : > { %v1340_v52 = vrot.slane %v1333_v37, %v3644_v7  ;;  %v1348_v53 = vrot.slane %v1341_v46, %v3644_v7  ;;  %v1023_v56 = vcombine.low %v1006_v38, %v1014_v42  ;;  %v1065_v57 = vcombine.low %v1040_v44, %v1048_v45 }
 0x208   : > { %v1073_v55 = vcombine.low %v1056_v47, %v1064_v48  ;;  %v1299_v58 = vcombine.low %v1290_v49, %v1298_v41  ;;  %v1015_v61 = vcombine.low %v990_v50, %v998_v51  ;;  %v1300_v15 = vcombine.high %v1290_v49, %v1298_v41 }
 0x209   : > { %v1349_v60 = vcombine.low %v1340_v52, %v1348_v53  ;;  %v1030_v2 = vrot.slane %v1023_v56, %v3644_v7  ;;  %v1072_v3 = vrot.slane %v1065_v57, %v3644_v7  ;;  %v1350_v13 = vcombine.high %v1340_v52, %v1348_v53  ;;  %v1368_v56 = vpop.permute.xlu0 %1367  ;;  %v1366_v57 = vpop.permute.xlu1 %1365 }
 0x20a   : > { %v1080_v63 = vrot.slane %v1073_v55, %v3644_v7  ;;  %v1022_v5 = vrot.slane %v1015_v61, %v3644_v7  ;;  %v1354_v8 = vshrl.u32 %v1299_v58, 16  ;;  %v1360_v22 = vshrl.u32 %v1300_v15, 16 }
 0x20b   : > { %v1353_v62 = vpack.i.b16 %v1349_v60, %v1299_v58  ;;  %v1355_v4 = vshrl.u32 %v1349_v60, 16  ;;  %v1359_v17 = vpack.i.b16 %v1350_v13, %v1300_v15  ;;  %v1361_v20 = vshrl.u32 %v1350_v13, 16 }
 0x20c   : > { %v1081_v6 = vcombine.low %v1072_v3, %v1080_v63  ;;  %v1031_v9 = vcombine.low %v1022_v5, %v1030_v2  ;;  %v1082_v21 = vcombine.high %v1072_v3, %v1080_v63  ;;  %v1032_v23 = vcombine.high %v1022_v5, %v1030_v2 }
 0x20d   : > { %v1640_v1 = vsel %vm1635_vm1, %v1353_v62, 0  ;;  %v1356_v10 = vpack.i.b16 %v1355_v4, %v1354_v8  ;;  %v1734_v19 = vsel %vm1635_vm1, %v1359_v17, 0  ;;  %v1362_v24 = vpack.i.b16 %v1361_v20, %v1360_v22 }
 0x20e   : > { %2749 = vmatpush3.bf16.xpose.msra.mxu1 %v1640_v1  ;;  %v1085_v11 = vpack.i.b16 %v1081_v6, %v1031_v9  ;;  %v1087_v14 = vshrl.u32 %v1081_v6, 16  ;;  %v1086_v16 = vshrl.u32 %v1031_v9, 16  ;;  %v1091_v25 = vpack.i.b16 %v1082_v21, %v1032_v23 }
 0x20f   : > { %2754 = vmatprep.subr.bf16.mxu1 %v3311_v0  ;;  %v1687_v12 = vsel %vm1635_vm1, %v1356_v10, 0  ;;  %v1781_v26 = vsel %vm1635_vm1, %v1362_v24, 0  ;;  %v1093_v27 = vshrl.u32 %v1082_v21, 16  ;;  %v1092_v28 = vshrl.u32 %v1032_v23, 16 }
 0x210   : > { %v1088_v18 = vpack.i.b16 %v1087_v14, %v1086_v16  ;;  %v1375_v61 = vshrl.u32 %v3633_v43, 16  ;;  %v1376_v62 = vshrl.u32 %v1366_v57, 16  ;;  %v1373_v1 = vpack.i.b16 %v1366_v57, %v3633_v43 }
 0x211   : > { %v1094_v29 = vpack.i.b16 %v1093_v27, %v1092_v28  ;;  %v1383_v8 = vshrl.u32 %v1368_v56, 16 }
 0x212   : > { %v1377_v4 = vpack.i.b16 %v1376_v62, %v1375_v61  ;;  %v1387_v6 = vcombine.high %v1373_v1, %v3637_v54  ;;  %v1394_v14 = vrot.slane %v1373_v1, %v3639_v59 }
 0x214   : > { %v1453_v15 = vcombine.high %v1377_v4, %v3637_v54  ;;  %v1460_v20 = vrot.slane %v1377_v4, %v3639_v59 }
 0x215   : > { %2751 = vmatmul.mubr.msk.bf16.vlgmr.msra.gmra.mxu1 %vm1635_vm1, %v1085_v11 }
 0x216   : > { %2755 = vmatpush3.bf16.xpose.msra.mxu1 %v1687_v12  ;;  %2756 = vmatprep.mubr.msk.bf16.mxu1 %vm3312_vm0, %v3311_v0 }
 0x217   : > { %2760 = vmatprep.subr.bf16.mxu1 %v3311_v0 }
 0x21d   : > { %2757 = vmatmul.mubr.msk.bf16.vlgmr.msra.gmra.mxu1 %vm1635_vm1, %v1088_v18 }
 0x21e   : > { %2761 = vmatpush3.bf16.xpose.msra.mxu1 %v1734_v19  ;;  %2762 = vmatprep.mubr.msk.bf16.mxu1 %vm3312_vm0, %v3311_v0  ;;  %v1401_v19 = vrot.slane %v1387_v6, %v3639_v59 }
 0x21f   : > { %2766 = vmatprep.subr.bf16.mxu1 %v3311_v0 }
 0x225   : > { %2763 = vmatmul.mubr.msk.bf16.vlgmr.msra.gmra.mxu1 %vm1635_vm1, %v1091_v25  ;;  %v1467_v25 = vrot.slane %v1453_v15, %v3639_v59 }
 0x226   : > { %2767 = vmatpush3.bf16.xpose.msra.mxu1 %v1781_v26  ;;  %2768 = vmatprep.mubr.msk.bf16.mxu1 %vm3312_vm0, %v3311_v0 }
 0x227   : > { %2778 = vmatprep.subr.bf16.mxu1 %v3311_v0 }
 0x22d   : > { %2769 = vmatmul.mubr.msk.bf16.vlgmr.msra.gmra.mxu1 %vm1635_vm1, %v1094_v29 }
 0x22e   : > { %2780 = vmatprep.mubr.msk.bf16.mxu1 %vm3312_vm0, %v3311_v0 }
 0x2d5   : > { %v1676_v30 = vpop.f32.mrf.mxu1 }
 0x2d6   : > { %v1825_v31 = vsel %vm1824_vm2, %v1676_v30, -inf }
 0x2d7   : > { %v2752_v32 = vpop.f32.mrf.mxu1  ;;  %1826 = vmax.xlane.f32.xlu0 %v1825_v31 }
 0x2d9   : > { %v1679_v33 = vpop.f32.mrf.mxu1 }
 0x2da   : > { %v1828_v34 = vsel %vm1824_vm2, %v1679_v33, -inf }
 0x2db   : > { %v2753_v35 = vpop.f32.mrf.mxu1  ;;  %1829 = vmax.xlane.f32.xlu1 %v1828_v34 }
 0x2dd   : > { %v1723_v36 = vpop.f32.mrf.mxu1 }
 0x2de   : > { %v1831_v37 = vsel %vm1824_vm2, %v1723_v36, -inf }
 0x2df   : > { %v2758_v38 = vpop.f32.mrf.mxu1  ;;  %1832 = vmax.xlane.f32.xlu0 %v1831_v37 }
 0x2e1   : > { %v3730_v39 = vpop.f32.mrf.mxu1 }
 0x2e2   : > { %v1834_v40 = vsel %vm1824_vm2, %v3730_v39, -inf }
 0x2e3   : > { %v2759_v41 = vpop.f32.mrf.mxu1  ;;  %1835 = vmax.xlane.f32.xlu0 %v1834_v40 }
 0x2e5   : > { %v3734_v42 = vpop.f32.mrf.mxu1 }
 0x2e6   : > { %v1837_v53 = vsel %vm1824_vm2, %v3734_v42, -inf }
 0x2e7   : > { %v2764_v44 = vpop.f32.mrf.mxu1 }
 0x2e9   : > { %v3736_v45 = vpop.f32.mrf.mxu1 }
 0x2ea   : > { %v1840_v46 = vsel %vm1824_vm2, %v3736_v45, -inf }
 0x2eb   : > { %v2765_v47 = vpop.f32.mrf.mxu1  ;;  %1841 = vmax.xlane.f32.xlu0 %v1840_v46 }
 0x2ec   : > { %1369 = vrot.lane.b32.xlu1 %v3633_v43, %s3313_s11 }
 0x2ed   : > { %v3742_v48 = vpop.f32.mrf.mxu1 }
 0x2ee   : > { %v1843_v49 = vsel %vm1824_vm2, %v3742_v48, -inf }
 0x2ef   : > { %v2770_v50 = vpop.f32.mrf.mxu1  ;;  %1844 = vmax.xlane.f32.xlu0 %v1843_v49 }
 0x2f1   : > { %v3746_v51 = vpop.f32.mrf.mxu1 }
 0x2f2   : > { %v1846_v55 = vsel %vm1824_vm2, %v3746_v51, -inf }
 0x2f3   : > { %v2771_v52 = vpop.f32.mrf.mxu1 }
 0x310   : > { %1838 = vmax.xlane.f32.xlu1 %v1837_v53 }
 0x314   : > { %1847 = vmax.xlane.f32.xlu1 %v1846_v55 }
 0x360   : > { %v1827_v58 = vpop.xlane.xlu0 %1826 }
 0x361   : > { %v1849_v60 = vsub.f32 %v1676_v30, %v1827_v58 }
 0x363   : > { %v1857_v63 = vmul.f32 1.442695, %v1849_v60 }
 0x364   : > { %v1830_v2 = vpop.xlane.xlu1 %1829 }
 0x365   : > { %2988 = vpow2.f32 %v1857_v63  ;;  %v1850_v3 = vsub.f32 %v1679_v33, %v1830_v2 }
 0x367   : > { %v1859_v5 = vmul.f32 1.442695, %v1850_v3 }
 0x368   : > { %v1833_v9 = vpop.xlane.xlu0 %1832  ;;  %v1370_v10 = vpop.permute.xlu1 %1369 }
 0x369   : > { %2990 = vpow2.f32 %v1859_v5  ;;  %v1851_v11 = vsub.f32 %v1723_v36, %v1833_v9  ;;  %v1381_v12 = vpack.i.b16 %v1370_v10, %v1368_v56  ;;  %v1384_v13 = vshrl.u32 %v1370_v10, 16 }
 0x36b   : > { %v1861_v16 = vmul.f32 1.442695, %v1851_v11  ;;  %v1385_v43 = vpack.i.b16 %v1384_v13, %v1383_v8  ;;  %v1402_v17 = vcombine.high %v1381_v12, %v3637_v54  ;;  %v1409_v18 = vrot.slane %v1381_v12, %v3639_v59 }
 0x36c   : > { %v1836_v21 = vpop.xlane.xlu0 %1835 }
 0x36d   : > { %2992 = vpow2.f32 %v1861_v16  ;;  %v1416_v22 = vrot.slane %v1402_v17, %v3639_v59  ;;  %v1417_v23 = vcombine.low %v1394_v14, %v1409_v18  ;;  %v1418_v24 = vcombine.high %v1394_v14, %v1409_v18 }
 0x36e   : > { %v1468_v26 = vcombine.high %v1385_v43, %v3637_v54  ;;  %v1475_v27 = vrot.slane %v1385_v43, %v3639_v59  ;;  %v1852_v28 = vsub.f32 %v3730_v39, %v1836_v21 }
 0x36f   : > { %v1425_v29 = vrot.slane %v1417_v23, %v3644_v7  ;;  %v1432_v30 = vrot.slane %v1418_v24, %v3644_v7  ;;  %v1433_v31 = vcombine.low %v1401_v19, %v1416_v22  ;;  %v1434_v32 = vcombine.high %v1401_v19, %v1416_v22 }
 0x370   : > { %v1482_v33 = vrot.slane %v1468_v26, %v3639_v59  ;;  %v1483_v34 = vcombine.low %v1460_v20, %v1475_v27  ;;  %v1484_v35 = vcombine.high %v1460_v20, %v1475_v27  ;;  %v1863_v36 = vmul.f32 1.442695, %v1852_v28 }
 0x371   : > { %v1441_v37 = vrot.slane %v1433_v31, %v3644_v7  ;;  %v1448_v38 = vrot.slane %v1434_v32, %v3644_v7  ;;  %v1519_v54 = vcombine.low %v1425_v29, %v1432_v30  ;;  %v2599_v40 = vcombine.high %v1425_v29, %v1432_v30 }
 0x372   : > { %v2989_v41 = vpop.eup %2988  ;;  %v1491_v39 = vrot.slane %v1483_v34, %v3644_v7  ;;  %v1498_v44 = vrot.slane %v1484_v35, %v3644_v7  ;;  %v1499_v46 = vcombine.low %v1467_v25, %v1482_v33  ;;  %v1500_v47 = vcombine.high %v1467_v25, %v1482_v33 }
 0x373   : > { %v1526_v49 = vrot.slane %v1519_v54, %v3639_v59  ;;  %v1534_v50 = vrot.slane %v2599_v40, %v3639_v59  ;;  %v1535_v52 = vcombine.low %v1441_v37, %v1448_v38  ;;  %v2600_v53 = vcombine.high %v1441_v37, %v1448_v38 }
 0x374   : > { %v1507_v55 = vrot.slane %v1499_v46, %v3644_v7  ;;  %v1514_v56 = vrot.slane %v1500_v47, %v3644_v7  ;;  %v1569_v57 = vcombine.low %v1491_v39, %v1498_v44  ;;  %v2601_v58 = vcombine.high %v1491_v39, %v1498_v44  ;;  %v1842_v60 = vpop.xlane.xlu0 %1841 }
 0x375   : > { %v1542_v61 = vrot.slane %v1535_v52, %v3639_v59  ;;  %v1550_v62 = vrot.slane %v2600_v53, %v3639_v59  ;;  %2994 = vpow2.f32 %v1863_v36  ;;  %v1873_v63 = vsel %vm1824_vm2, %v2989_v41, 0.0 }
 0x376   : > { %v2991_v1 = vpop.eup %2990  ;;  %v1576_v2 = vrot.slane %v1569_v57, %v3639_v59  ;;  %v1584_v3 = vrot.slane %v2601_v58, %v3639_v59  ;;  %v1585_v4 = vcombine.low %v1507_v55, %v1514_v56  ;;  %v2602_v5 = vcombine.high %v1507_v55, %v1514_v56  ;;  %1874 = vadd.xlane.f32.xlu0 %v1873_v63  ;;  %v2980_v55 = vld [vmem:[#allocation13 + $0x8] sm:$0xff]   ;;  %v2981_v56 = vld [vmem:[#allocation13 + $0x18] sm:$0xff]   ;;  %v2982_v57 = vld [vmem:[#allocation13] sm:$0xff]  }
 0x377   : > { %v1854_v6 = vsub.f32 %v3736_v45, %v1842_v60  ;;  %v1876_v8 = vsel %vm1824_vm2, %v2991_v1, 0.0  ;;  %v1551_v9 = vcombine.low %v1526_v49, %v1534_v50  ;;  %v1559_v10 = vcombine.low %v1542_v61, %v1550_v62  ;;  %v2983_v58 = vld [vmem:[#allocation13 + $0x10] sm:$0xff]  }
 0x378   : > { %1877 = vadd.xlane.f32.xlu1 %v1876_v8  ;;  %v1592_v11 = vrot.slane %v1585_v4, %v3639_v59  ;;  %v1600_v12 = vrot.slane %v2602_v5, %v3639_v59  ;;  %v1601_v13 = vcombine.low %v1576_v2, %v1584_v3  ;;  %v1905_v30 = vpack.c.bf16 %v2991_v1, %v2989_v41  ;;  %v1845_v36 = vpop.xlane.xlu0 %1844 }
 0x379   : > { %v1867_v14 = vmul.f32 1.442695, %v1854_v6  ;;  %v1566_v15 = vrot.slane %v1559_v10, %v3644_v7  ;;  %v1558_v43 = vrot.slane %v1551_v9, %v3644_v7  ;;  %v1855_v37 = vsub.f32 %v3742_v48, %v1845_v36 }
 0x37a   : > { %v2993_v16 = vpop.eup %2992  ;;  %v1609_v17 = vcombine.low %v1592_v11, %v1600_v12  ;;  %v1608_v19 = vrot.slane %v1601_v13, %v3644_v7 }
 0x37b   : > { %2996 = vpow2.f32 %v1867_v14  ;;  %v1879_v45 = vsel %vm1824_vm2, %v2993_v16, 0.0  ;;  %v1567_v18 = vcombine.low %v1558_v43, %v1566_v15  ;;  %v1568_v25 = vcombine.high %v1558_v43, %v1566_v15  ;;  %v2984_v15 = vld [vmem:[#allocation13 + $0x28] sm:$0xff]  }
 0x37c   : > { %1880 = vadd.xlane.f32.xlu0 %v1879_v45  ;;  %v1616_v20 = vrot.slane %v1609_v17, %v3644_v7  ;;  %v1869_v40 = vmul.f32 1.442695, %v1855_v37 }
 0x37d   : > { %v1623_v23 = vshrl.u32 %v1567_v18, 16  ;;  %v1631_v32 = vshrl.u32 %v1568_v25, 16 }
 0x37e   : > { %v1617_v21 = vcombine.low %v1608_v19, %v1616_v20  ;;  %v1618_v22 = vcombine.high %v1608_v19, %v1616_v20  ;;  %v2985_v20 = vld [vmem:[#allocation13 + $0x20] sm:$0xff]  }
 0x380   : > { %v1621_v59 = vpack.i.b16 %v1617_v21, %v1567_v18  ;;  %v1624_v24 = vshrl.u32 %v1617_v21, 16  ;;  %v1632_v28 = vshrl.u32 %v1618_v22, 16  ;;  %v1629_v31 = vpack.i.b16 %v1618_v22, %v1568_v25  ;;  %v2986_v18 = vld [vmem:[#allocation13 + $0x38] sm:$0xff]   ;;  %v2987_v21 = vld [vmem:[#allocation13 + $0x30] sm:$0xff]  }
 0x382   : > { %v2995_v26 = vpop.eup %2994  ;;  %2773 = vmatpush3.bf16.msra.mxu0 %v1621_v59  ;;  %v1625_v27 = vpack.i.b16 %v1624_v24, %v1623_v23  ;;  %v1633_v33 = vpack.i.b16 %v1632_v28, %v1631_v32 }
 0x383   : > { %v1882_v29 = vsel %vm1824_vm2, %v2995_v26, 0.0  ;;  %2784 = vmatprep.subr.bf16.mxu0 %v3311_v0  ;;  %v1906_v7 = vpack.c.bf16 %v2995_v26, %v2993_v16 }
 0x384   : > { %1883 = vadd.xlane.f32.xlu1 %v1882_v29  ;;  %2779 = vmatpush3.bf16.msra.mxu1 %v1625_v27 }
 0x385   : > { %2775 = vmatmul.mubr.msk.bf16.vlgmr.msra.gmra.mxu0 %vm1824_vm2, %v1905_v30  ;;  %2790 = vmatprep.subr.bf16.mxu1 %v3311_v0 }
 0x386   : > { %2785 = vmatpush3.bf16.msra.mxu0 %v1629_v31  ;;  %2786 = vmatprep.mubr.msk.bf16.mxu0 %vm3312_vm0, %v3311_v0 }
 0x387   : > { %2781 = vmatmul.mubr.msk.bf16.vlgmr.msra.gmra.mxu1 %vm1824_vm2, %v1906_v7  ;;  %2796 = vmatprep.subr.bf16.mxu0 %v3311_v0 }
 0x388   : > { %v2997_v34 = vpop.eup %2996  ;;  %2791 = vmatpush3.bf16.msra.mxu1 %v1633_v33  ;;  %2792 = vmatprep.mubr.msk.bf16.mxu1 %vm3312_vm0, %v3311_v0 }
 0x389   : > { %v1888_v35 = vsel %vm1824_vm2, %v2997_v34, 0.0  ;;  %2804 = vmatprep.subr.bf16.mxu1 %v3311_v0 }
 0x38a   : > { %1889 = vadd.xlane.f32.xlu1 %v1888_v35 }
 0x399   : > { %v1839_v38 = vpop.xlane.xlu1 %1838 }
 0x39a   : > { %v1853_v54 = vsub.f32 %v3734_v42, %v1839_v38 }
 0x39c   : > { %v1865_v41 = vmul.f32 1.442695, %v1853_v54 }
 0x39d   : > { %v1848_v39 = vpop.xlane.xlu1 %1847 }
 0x39e   : > { %2998 = vpow2.f32 %v1865_v41  ;;  %v1856_v44 = vsub.f32 %v3746_v51, %v1848_v39 }
 0x39f   : > { %3000 = vpow2.f32 %v1869_v40 }
 0x3a0   : > { %v1871_v46 = vmul.f32 1.442695, %v1856_v44 }
 0x3a2   : > { %3002 = vpow2.f32 %v1871_v46 }
 0x3ab   : > { %v2999_v47 = vpop.eup %2998 }
 0x3ac   : > { %v1885_v49 = vsel %vm1824_vm2, %v2999_v47, 0.0  ;;  %v1907_v50 = vpack.c.bf16 %v2997_v34, %v2999_v47  ;;  %v3001_v52 = vpop.eup %3000 }
 0x3ad   : > { %1886 = vadd.xlane.f32.xlu0 %v1885_v49  ;;  %v1891_v42 = vsel %vm1824_vm2, %v3001_v52, 0.0 }
 0x3ae   : > { %2787 = vmatmul.mubr.msk.bf16.vlgmr.msra.gmra.mxu0 %vm1824_vm2, %v1907_v50 }
 0x3af   : > { %v3003_v48 = vpop.eup %3002  ;;  %2800 = vmatprep.mubr.msk.bf16.mxu0 %vm3312_vm0, %v3311_v0  ;;  %2797 = vmatpush3.bf16.msra.mxu0 %v2980_v55 }
 0x3b0   : > { %v1894_v53 = vsel %vm1824_vm2, %v3003_v48, 0.0  ;;  %v1908_v51 = vpack.c.bf16 %v3003_v48, %v3001_v52  ;;  %2798 = vmatprep.subr.bf16.mxu0 %v3311_v0 }
 0x3b1   : > { %1892 = vadd.xlane.f32.xlu0 %v1891_v42  ;;  %1895 = vadd.xlane.f32.xlu1 %v1894_v53 }
 0x3b2   : > { %2793 = vmatmul.mubr.msk.bf16.vlgmr.msra.gmra.mxu1 %vm1824_vm2, %v1908_v51 }
 0x3b3   : > { %2808 = vmatprep.mubr.msk.bf16.mxu1 %vm3312_vm0, %v3311_v0  ;;  %2805 = vmatpush3.bf16.msra.mxu1 %v2981_v56 }
 0x3b4   : > { %2806 = vmatprep.subr.bf16.mxu1 %v3311_v0  ;;  %2799 = vmatpush3.bf16.msra.mxu0 %v2982_v57  ;;  %v2623_v57 = vld [vmem:[%s3894_s7] ss:$0 sm:$0xff] }
 0x3b5   : > { %2812 = vmatprep.subr.bf16.mxu0 %v3311_v0 }
 0x3b7   : > { %2807 = vmatpush3.bf16.msra.mxu1 %v2983_v58 }
 0x3b8   : > { %2820 = vmatprep.subr.bf16.mxu1 %v3311_v0 }
 0x3ff   : > { %v1875_v60 = vpop.xlane.xlu0 %1874 }
 0x400   : > { %3004 = vrcp.f32 %v1875_v60 }
 0x401   : > { %v1878_v61 = vpop.xlane.xlu1 %1877 }
 0x402   : > { %3006 = vrcp.f32 %v1878_v61 }
 0x405   : > { %v1881_v62 = vpop.xlane.xlu0 %1880 }
 0x406   : > { %3008 = vrcp.f32 %v1881_v62 }
 0x40d   : > { %v1884_v63 = vpop.xlane.xlu1 %1883  ;;  %v3005_v4 = vpop.eup %3004 }
 0x40e   : > { %3010 = vrcp.f32 %v1884_v63 }
 0x40f   : > { %v3007_v5 = vpop.eup %3006 }
 0x413   : > { %v3009_v9 = vpop.eup %3008  ;;  %v1890_v59 = vpop.xlane.xlu1 %1889 }
 0x414   : > { %3012 = vrcp.f32 %v1890_v59 }
 0x41b   : > { %v3011_v12 = vpop.eup %3010 }
 0x421   : > { %v3013_v27 = vpop.eup %3012 }
 0x436   : > { %v1887_v22 = vpop.xlane.xlu0 %1886 }
 0x437   : > { %3014 = vrcp.f32 %v1887_v22 }
 0x43a   : > { %v1893_v23 = vpop.xlane.xlu0 %1892  ;;  %v1896_v24 = vpop.xlane.xlu1 %1895 }
 0x43b   : > { %3016 = vrcp.f32 %v1893_v23 }
 0x43c   : > { %3018 = vrcp.f32 %v1896_v24 }
 0x444   : > { %v3015_v28 = vpop.eup %3014 }
 0x445   : > { %v1946_v1 = vpop.f32.mrf.mxu0 }
 0x446   : > { %v2085_v10 = vmul.f32 %v3005_v4, %v1946_v1 }
 0x447   : > { %v2776_v2 = vpop.f32.mrf.mxu0  ;;  %v1990_v3 = vpop.f32.mrf.mxu1 }
 0x448   : > { %v2087_v16 = vmul.f32 %v3009_v9, %v1990_v3  ;;  %v3017_v33 = vpop.eup %3016 }
 0x449   : > { %v1949_v6 = vpop.f32.mrf.mxu0  ;;  %v2782_v8 = vpop.f32.mrf.mxu1 }
 0x44a   : > { %v2086_v11 = vmul.f32 %v3007_v5, %v1949_v6  ;;  %v3019_v35 = vpop.eup %3018 }
 0x44b   : > { %v2777_v13 = vpop.f32.mrf.mxu0  ;;  %v1993_v14 = vpop.f32.mrf.mxu1 }
 0x44c   : > { %v2093_v43 = vpack.c.bf16 %v2086_v11, %v2085_v10  ;;  %v2088_v17 = vmul.f32 %v3011_v12, %v1993_v14 }
 0x44d   : > { %v2783_v45 = vpop.f32.mrf.mxu1 }
 0x44e   : > { %v2094_v19 = vpack.c.bf16 %v2088_v17, %v2087_v16  ;;  %2801 = vmatmul.mubr.msk.bf16.vlgmr.msra.gmra.mxu0 %vm1635_vm1, %v2093_v43 }
 0x44f   : > { %2813 = vmatpush3.bf16.msra.mxu0 %v2984_v15  ;;  %2816 = vmatprep.mubr.msk.bf16.mxu0 %vm3312_vm0, %v3311_v0 }
 0x450   : > { %2809 = vmatmul.mubr.msk.bf16.vlgmr.msra.gmra.mxu1 %vm1635_vm1, %v2094_v19  ;;  %2814 = vmatprep.subr.bf16.mxu0 %v3311_v0 }
 0x451   : > { %2821 = vmatpush3.bf16.msra.mxu1 %v2986_v18  ;;  %2824 = vmatprep.mubr.msk.bf16.mxu1 %vm3312_vm0, %v3311_v0 }
 0x452   : > { %2822 = vmatprep.subr.bf16.mxu1 %v3311_v0 }
 0x453   : > { %2815 = vmatpush3.bf16.msra.mxu0 %v2985_v20 }
 0x455   : > { %2823 = vmatpush3.bf16.msra.mxu1 %v2987_v21 }
 0x46e   : > { %v2034_v25 = vpop.f32.mrf.mxu0 }
 0x46f   : > { %v2089_v31 = vmul.f32 %v3015_v28, %v2034_v25 }
 0x470   : > { %v2788_v26 = vpop.f32.mrf.mxu0 }
 0x472   : > { %v2037_v29 = vpop.f32.mrf.mxu0  ;;  %v2078_v30 = vpop.f32.mrf.mxu1 }
 0x473   : > { %v2090_v32 = vmul.f32 %v3013_v27, %v2037_v29  ;;  %v2091_v37 = vmul.f32 %v3017_v33, %v2078_v30 }
 0x474   : > { %v2789_v7 = vpop.f32.mrf.mxu0  ;;  %v2794_v0 = vpop.f32.mrf.mxu1 }
 0x475   : > { %v2095_v34 = vpack.c.bf16 %v2090_v32, %v2089_v31 }
 0x476   : > { %v2081_v36 = vpop.f32.mrf.mxu1 }
 0x477   : > { %v2092_v38 = vmul.f32 %v3019_v35, %v2081_v36  ;;  %2817 = vmatmul.mubr.msk.bf16.vlgmr.msra.gmra.mxu0 %vm1635_vm1, %v2095_v34 }
 0x478   : > { %v2795_v54 = vpop.f32.mrf.mxu1 }
 0x479   : > { %v2096_v40 = vpack.c.bf16 %v2092_v38, %v2091_v37 }
 0x47b   : > { %2825 = vmatmul.mubr.msk.bf16.vlgmr.msra.gmra.mxu1 %vm1635_vm1, %v2096_v40 }
 0x50e   : > { %v2162_v41 = vpop.f32.mrf.mxu0 }
 0x510   : > { %v2802_v39 = vpop.f32.mrf.mxu0  ;;  %v2218_v44 = vpop.f32.mrf.mxu1 }
 0x511   : > { %v2337_v42 = vadd.f32 %v2218_v44, %v2162_v41 }
 0x512   : > { %v2165_v46 = vpop.f32.mrf.mxu0  ;;  %v2810_v47 = vpop.f32.mrf.mxu1 }
 0x514   : > { %v2803_v49 = vpop.f32.mrf.mxu0  ;;  %v2221_v50 = vpop.f32.mrf.mxu1 }
 0x515   : > { %v2340_v58 = vadd.f32 %v2221_v50, %v2165_v46 }
 0x516   : > { %v2811_v52 = vpop.f32.mrf.mxu1 }
 0x537   : > { %v2274_v48 = vpop.f32.mrf.mxu0 }
 0x538   : > { %v2338_v51 = vadd.f32 %v2337_v42, %v2274_v48 }
 0x539   : > { %v2818_v53 = vpop.f32.mrf.mxu0 }
 0x53b   : > { %v2277_v55 = vpop.f32.mrf.mxu0  ;;  %v2330_v56 = vpop.f32.mrf.mxu1 }
 0x53c   : > { %v2339_v60 = vadd.f32 %v2338_v51, %v2330_v56  ;;  %v2341_v63 = vadd.f32 %v2340_v58, %v2277_v55 }
 0x53d   : > { %v2819_v61 = vpop.f32.mrf.mxu0  ;;  %v2826_v62 = vpop.f32.mrf.mxu1 }
 0x53e   : > { %v2350_v1 = vadd.f32 %v2623_v57, %v2339_v60 }
 0x53f   : > { %v2333_v2 = vpop.f32.mrf.mxu1 }
 0x540   : > { %2352 = vst [vmem:[%s476_s4] sm:$0xff] %v2350_v1  ;;  %v2342_v3 = vadd.f32 %v2341_v63, %v2333_v2 }
 0x541   : > { %v2827_v4 = vpop.f32.mrf.mxu1 }
 0x542   : > { %v2351_v5 = vadd.f32 %v2623_v57, %v2342_v3 }
 0x544   : > { %2353 = vst [vmem:[%s476_s4 + $0x8] sm:$0xff] %v2351_v5 }
 0x545   : > { %3221 = shalt.err (!%p3218_p0)
}
 0x546   : > { %s3222_s19 = scalar_lea.hbm %s3839_s14, 256  ;;  %s3226_s26 = scalar_lea.hbm %s3895_s8, 512 }
 0x547   : > { %p3223_p11 = scmp.ne.s32.totalorder %s3839_s14, %s3222_s19  ;;  %p3227_p8 = scmp.lt.s32.totalorder %s3839_s14, %s3895_s8 }
 0x548   : > { %p3228_p12 = scmp.lt.s32.totalorder %s3226_s26, %s3222_s19 }
 0x549   : > { %p3224_p10 = pnand %p3223_p11, %p3464_p7 }
 0x54a   : > { %p3229_p5 = por %p3228_p12, %p3227_p8 }
 0x54b   : > { %p3225_p1 = pneg %p3224_p10 }
 0x54d   : > { %p3230_p4 = pnand %p3229_p5, %p3225_p1 }
 0x54f   : > { %3233 = shalt.err (!%p3230_p4)
}
 0x550   : > { %s3320_s13 = smov 128   ;;  %s3321_s5 = smov 8  }
 0x551   : > { %2850 = dma.vmem_to_hbm [thread:$0]  (%p3464_p7), %s3834_s24, 256, %s3839_s14, %s2355_s27, %s3320_s13, %s3320_s13, %s3321_s5  }
 0x552 PF: > { %s3941_s1 = sld [smem:[#allocation20_spill]] }
 0x553   : > { %s3942_s25 = sld [smem:[#allocation23_spill]] }
 0x554   : > { %s3943_s16 = sld [smem:[#allocation22_spill]] }
 0x558   : > { %s2385_s4 = sand.u32 1, %s3941_s1  }
 0x559   : > { %p3944_p2 = scmp.ne.s32.totalorder %s3942_s25, 0  ;;  %s2386_s23 = scalar_lea.sflag [#allocation4], %s2385_s4 }
 0x55a   : > { %p3945_p3 = scmp.ge.s32.totalorder %s3943_s16, 2 }
 0x55c   : > { %p2876_p6 = pnand %p3945_p3, %p3944_p2 }
 0x55e   : > { %p2877_p9 = pneg %p2876_p6 }
 0x560   : > { %3275 = dma.done.wait (%p2877_p9), %s2386_s23, 256  }
 0x561   : > { %3277 = vsyncadd (%p2877_p9), %s2386_s23, 4294967040  ;;  %s29_s10 = sadd.s32 1, %s3943_s16   ;;  %s3946_s21 = sld [smem:[#allocation25_spill]] }
 0x562   : > { %p26_p13 = scmp.ge.s32.totalorder %s29_s10, 4   ;;  %s3947_s30 = sld [smem:[#allocation21_spill]] }
 0x563   : > { %s3948_s9 = sld [smem:[#allocation24_spill]]  ;;  %s3949_s27 = smov %s3284_s28 }
 0x564   : > { %s3950_s28 = smov %s3288_s29  ;;  %28 = sbr.rel (!%p26_p13) target bundleno = 15 (0xf), region = 137 }
 0x567   : > { %s3951_s29 = smov %s3946_s21 }
 0x569   :  { %2391 = vsyncpa [#allocation3], 1 }
 0x56a   :  { %2393 = vsyncpa [#allocation3 + $0x1], 1 }
 0x56b   :  { %2394 = vsyncpa [#allocation6], 1 }
 0x56c   :  { %2396 = vsyncpa [#allocation6 + $0x1], 1 }
 0x56d   :  { %2397 = vsyncpa [#allocation9], 1 }
 0x56e   :  { %2398 = vsyncpa [#allocation12], 1 }
 0x56f   :  { %2399 = vsyncpa [#allocation4], 1 }
 0x570   :  { %2401 = vsyncpa [#allocation4 + $0x1], 1 }

</bundles_post_ra>
